<compile_context>
chip_gen: v7x
topology: tpu7x:2x2x1
jax: 0.10.0
libtpu: 0.0.40
codegen_flags: <defaults>
</compile_context>

<pallas_src>
import jax
import jax.numpy as jnp
import numpy as np
from jax.experimental import pallas as pl
from jax.experimental.pallas import tpu as pltpu

KERNELS = (1, 3, 5, 7)
KMAX = 7
EPS = 1e-5


def _asa_kernel(x_ref, w_ref, gw_ref, gb_ref, mask_ref, out_ref):
    """Fused ASA attention forward (single block, lane dim = H*W).

    x_ref    : (B, KKCP, HW)  im2col columns (bias row included)
    w_ref    : (B, C4,  KKCP) 4 conv branches fused along the channel axis
    gw_ref   : (1, C4, 1)     gate affine weight per fused channel row
    gb_ref   : (1, C4, 1)     gate affine bias  per fused channel row
    mask_ref : (1, C4, 1)     1.0 -> channel-attention row, 0.0 -> spatial row
    out_ref  : (B, COUT, HW)  branch-summed output (pre channel-shuffle)
    """
    B, _, HW = x_ref.shape
    C4 = w_ref.shape[1]
    COUT = out_ref.shape[1]
    n_branches = C4 // COUT

    # ---- all 4 conv branches + bias as ONE MXU matmul ----------------------
    conv = jnp.einsum('bok,bkh->boh', w_ref[...], x_ref[...],
                      preferred_element_type=jnp.float32)        # (B, C4, HW)

    # ---- BatchNorm2d (training-mode batch stats, gamma=1, beta=0) + ReLU ---
    # one-pass variance: var = E[x^2] - E[x]^2
    inv_n = 1.0 / (B * HW)
    s1 = jnp.sum(conv, axis=2, keepdims=True)                    # (B, C4, 1)
    s2 = jnp.sum(conv * conv, axis=2, keepdims=True)
    bn_mean = jnp.sum(s1, axis=0, keepdims=True) * inv_n         # (1, C4, 1)
    bn_var = jnp.sum(s2, axis=0, keepdims=True) * inv_n - bn_mean * bn_mean
    y = jnp.maximum((conv - bn_mean) * jax.lax.rsqrt(bn_var + EPS), 0.0)

    # ---- per-(sample, channel) spatial stats --------------------------------
    # m1 is both AdaptiveAvgPool2d(1) (channel half) and the GroupNorm mean
    # (groups == channels) for the spatial half.
    inv_hw = 1.0 / HW
    m1 = jnp.sum(y, axis=2, keepdims=True) * inv_hw              # (B, C4, 1)
    m2 = jnp.sum(y * y, axis=2, keepdims=True) * inv_hw
    gn = (y - m1) * jax.lax.rsqrt(m2 - m1 * m1 + EPS)            # (B, C4, HW)

    # ---- gates: per-row blend of [avg-pool | groupnorm], shared affine ------
    mask = mask_ref[...]                                         # (1, C4, 1)
    gate_in = mask * m1 + (1.0 - mask) * gn                      # (B, C4, HW)
    gated = y * jax.nn.sigmoid(gw_ref[...] * gate_in + gb_ref[...])

    # ---- sum the 4 branches (sublane-tile-aligned channel-group slices) -----
    acc = gated[:, 0:COUT, :]
    for i in range(1, n_branches):
        acc = acc + gated[:, i * COUT:(i + 1) * COUT, :]
    out_ref[...] = acc


def asa_attention_forward(x_nchw, conv_ws, conv_bs, cweight, cbias, sweight, sbias):
    """x_nchw: (B, Cin, H, W) float32. Returns (B, Cout, H, W) float32."""
    B, CIN, H, W = x_nchw.shape
    COUT = conv_ws[0].shape[0]
    CH = COUT // 2
    NBR = len(conv_ws)
    C4 = NBR * COUT
    HW = H * W
    KKC = KMAX * KMAX * CIN
    KKCP = ((KKC + 1 + 127) // 128) * 128          # +1 bias row, round K to 128
    pad = KMAX // 2

    x = x_nchw.astype(jnp.float32)

    # ---- glue: im2col with spatial (HW) as the last/lane axis ---------------
    xp = jnp.pad(x, ((0, 0), (0, 0), (pad, pad), (pad, pad)))
    cols = []
    for dy in range(KMAX):
        for dx in range(KMAX):
            cols.append(xp[:, :, dy:dy + H, dx:dx + W])          # (B, Cin, H, W)
    x_col = jnp.stack(cols, axis=1).reshape(B, KKC, HW)          # K = (dy, dx, cin)
    ones = jnp.ones((B, 1, HW), jnp.float32)                     # bias row
    zpad = jnp.zeros((B, KKCP - KKC - 1, HW), jnp.float32)
    x_col = jnp.concatenate([x_col, ones, zpad], axis=1)         # (B, KKCP, HW)

    # ---- glue: fuse branch weights along the output-channel axis ------------
    w_rows = []
    for wk, bk in zip(conv_ws, conv_bs):
        k = wk.shape[-1]
        off = (KMAX - k) // 2
        w7 = jnp.zeros((COUT, CIN, KMAX, KMAX), jnp.float32)
        w7 = w7.at[:, :, off:off + k, off:off + k].set(wk.astype(jnp.float32))
        wf = jnp.transpose(w7, (0, 2, 3, 1)).reshape(COUT, KKC)  # K = (dy, dx, cin)
        wf = jnp.concatenate(
            [wf, bk.reshape(COUT, 1).astype(jnp.float32),
             jnp.zeros((COUT, KKCP - KKC - 1), jnp.float32)], axis=1)
        w_rows.append(wf)
    w_all = jnp.concatenate(w_rows, axis=0)                      # (C4, KKCP)
    w_all = jnp.broadcast_to(w_all[None], (B, C4, KKCP))
    # TODO(synk): on v6e/v7x cast x_col / w_all to bfloat16 for 2x MXU rate;
    # kept f32 here to stay bit-close to the f32 reference check below.

    # ---- per-fused-channel gate params and half-selection mask --------------
    gw1 = jnp.concatenate([cweight.reshape(CH), sweight.reshape(CH)]).astype(jnp.float32)
    gb1 = jnp.concatenate([cbias.reshape(CH), sbias.reshape(CH)]).astype(jnp.float32)
    mk1 = jnp.concatenate([jnp.ones((CH,), jnp.float32), jnp.zeros((CH,), jnp.float32)])
    gw = jnp.tile(gw1, NBR).reshape(1, C4, 1)
    gb = jnp.tile(gb1, NBR).reshape(1, C4, 1)
    mk = jnp.tile(mk1, NBR).reshape(1, C4, 1)

    out = pl.pallas_call(
        _asa_kernel,
        out_shape=jax.ShapeDtypeStruct((B, COUT, HW), jnp.float32),
        grid=(1,),
        in_specs=[
            pl.BlockSpec((B, KKCP, HW), lambda i: (0, 0, 0)),
            pl.BlockSpec((B, C4, KKCP), lambda i: (0, 0, 0)),
            pl.BlockSpec((1, C4, 1), lambda i: (0, 0, 0)),
            pl.BlockSpec((1, C4, 1), lambda i: (0, 0, 0)),
            pl.BlockSpec((1, C4, 1), lambda i: (0, 0, 0)),
        ],
        out_specs=pl.BlockSpec((B, COUT, HW), lambda i: (0, 0, 0)),
        compiler_params=pltpu.CompilerParams(dimension_semantics=("arbitrary",)),
    )(x_col, w_all, gw, gb, mk)

    # ---- glue: channel shuffle (groups=2; commutes with the branch sum) -----
    out = out.reshape(B, 2, CH, H, W)
    out = jnp.transpose(out, (0, 2, 1, 3, 4)).reshape(B, COUT, H, W)
    return out


def reference_forward(x_nchw, conv_ws, conv_bs, cweight, cbias, sweight, sbias):
    """Pure-JAX reference mirroring the PyTorch forward (hw == 0, train-mode BN)."""
    COUT = conv_ws[0].shape[0]
    CH = COUT // 2
    cw = cweight.reshape(1, CH, 1, 1)
    cb = cbias.reshape(1, CH, 1, 1)
    sw = sweight.reshape(1, CH, 1, 1)
    sb = sbias.reshape(1, CH, 1, 1)
    acc = None
    for wk, bk in zip(conv_ws, conv_bs):
        k = wk.shape[-1]
        y = jax.lax.conv_general_dilated(
            x_nchw, wk, window_strides=(1, 1),
            padding=[(k // 2, k // 2), (k // 2, k // 2)],
            dimension_numbers=("NCHW", "OIHW", "NCHW"),
            precision=jax.lax.Precision.HIGHEST,
        ) + bk[None, :, None, None]
        mean = y.mean(axis=(0, 2, 3), keepdims=True)
        var = ((y - mean) ** 2).mean(axis=(0, 2, 3), keepdims=True)
        y = jnp.maximum((y - mean) / jnp.sqrt(var + EPS), 0.0)
        x0, x1 = y[:, :CH], y[:, CH:]
        xn = x0 * jax.nn.sigmoid(cw * x0.mean(axis=(2, 3), keepdims=True) + cb)
        mu = x1.mean(axis=(2, 3), keepdims=True)
        vv = ((x1 - mu) ** 2).mean(axis=(2, 3), keepdims=True)
        gn = (x1 - mu) / jnp.sqrt(vv + EPS)
        xs = x1 * jax.nn.sigmoid(sw * gn + sb)
        out = jnp.concatenate([xn, xs], axis=1)
        b, c, h, w = out.shape
        out = out.reshape(b, 2, c // 2, h, w).transpose(0, 2, 1, 3, 4).reshape(b, c, h, w)
        acc = out if acc is None else acc + out
    return acc


if __name__ == "__main__":
    B, CIN, H, W = 2, 4, 16, 16
    COUT = 8                      # channel_out (must be even, //2 > 1)
    CH = COUT // 2

    key = jax.random.PRNGKey(0)
    keys = jax.random.split(key, 2 * len(KERNELS) + 1)
    x = jax.random.normal(keys[0], (B, CIN, H, W), dtype=jnp.float32)

    conv_ws, conv_bs = [], []
    for i, k in enumerate(KERNELS):
        conv_ws.append(0.1 * jax.random.normal(keys[1 + 2 * i], (COUT, CIN, k, k), jnp.float32))
        conv_bs.append(0.1 * jax.random.normal(keys[2 + 2 * i], (COUT,), jnp.float32))

    # Module parameter init (matches ASAattention.__init__): cweight/sweight = 0,
    # cbias/sbias = 1; BN/GN gamma=1, beta=0 (PyTorch defaults, folded in-kernel).
    cweight = jnp.zeros((CH,), jnp.float32)
    cbias = jnp.ones((CH,), jnp.float32)
    sweight = jnp.zeros((CH,), jnp.float32)
    sbias = jnp.ones((CH,), jnp.float32)

    out = asa_attention_forward(x, conv_ws, conv_bs, cweight, cbias, sweight, sbias)
    out = jax.block_until_ready(out)
    assert out.shape == (B, COUT, H, W)

    ref = reference_forward(x, conv_ws, conv_bs, cweight, cbias, sweight, sbias)
    np.testing.assert_allclose(np.asarray(out), np.asarray(ref), rtol=1e-3, atol=2e-3)

    print("KERNEL_OK")
</pallas_src>

<mosaic_0001>
module attributes {stable_mosaic.version = 11 : i64} {
  func.func @_asa_kernel(%arg0: i32, %arg1: memref<2x256x256xf32, #tpu.memory_space<vmem>>, %arg2: memref<2x32x256xf32, #tpu.memory_space<vmem>>, %arg3: memref<1x32x1xf32, #tpu.memory_space<vmem>>, %arg4: memref<1x32x1xf32, #tpu.memory_space<vmem>>, %arg5: memref<1x32x1xf32, #tpu.memory_space<vmem>>, %arg6: memref<2x8x256xf32, #tpu.memory_space<vmem>>) attributes {dimension_semantics = [#tpu.dimension_semantics<arbitrary>], iteration_bounds = array<i64: 1>, scalar_prefetch = 0 : i64, scratch_operands = 0 : i64, tpu.core_type = #tpu.core_type<tc>, window_params = [{pipeline_mode = #tpu.pipeline_mode<synchronous>, transform_indices = @transform_0, window_bounds = array<i64: 2, 256, 256>}, {pipeline_mode = #tpu.pipeline_mode<synchronous>, transform_indices = @transform_1, window_bounds = array<i64: 2, 32, 256>}, {pipeline_mode = #tpu.pipeline_mode<synchronous>, transform_indices = @transform_2, window_bounds = array<i64: 1, 32, 1>}, {pipeline_mode = #tpu.pipeline_mode<synchronous>, transform_indices = @transform_3, window_bounds = array<i64: 1, 32, 1>}, {pipeline_mode = #tpu.pipeline_mode<synchronous>, transform_indices = @transform_4, window_bounds = array<i64: 1, 32, 1>}, {pipeline_mode = #tpu.pipeline_mode<synchronous>, transform_indices = @transform_5, window_bounds = array<i64: 2, 8, 256>}]} {
    %c0 = arith.constant 0 : index
    %c0_0 = arith.constant 0 : index
    %c0_1 = arith.constant 0 : index
    %0 = vector.load %arg2[%c0, %c0_0, %c0_1] : memref<2x32x256xf32, #tpu.memory_space<vmem>>, vector<2x32x256xf32>
    %c0_2 = arith.constant 0 : index
    %c0_3 = arith.constant 0 : index
    %c0_4 = arith.constant 0 : index
    %1 = vector.load %arg1[%c0_2, %c0_3, %c0_4] : memref<2x256x256xf32, #tpu.memory_space<vmem>>, vector<2x256x256xf32>
    "tpu.trace_start"() <{level = 10 : i32, message = "bok,bkh->boh"}> : () -> ()
    %cst = arith.constant dense<0.000000e+00> : vector<2x32x256xf32>
    %2 = tpu.matmul %0, %1, %cst {dimension_numbers = #tpu.dot_dimension_numbers<[2], [1], [1], [2], [0, 0, 0, 1, 1, 2], [0], [0]>} : vector<2x32x256xf32>, vector<2x256x256xf32>, vector<2x32x256xf32> -> vector<2x32x256xf32>
    "tpu.trace_stop"() : () -> ()
    %cst_5 = arith.constant dense<0.000000e+00> : vector<2x32xf32>
    %3 = vector.multi_reduction <add>, %2, %cst_5 [2] : vector<2x32x256xf32> to vector<2x32xf32>
    %4 = vector.shape_cast %3 : vector<2x32xf32> to vector<2x32x1xf32>
    %5 = arith.mulf %2, %2 : vector<2x32x256xf32>
    %cst_6 = arith.constant dense<0.000000e+00> : vector<2x32xf32>
    %6 = vector.multi_reduction <add>, %5, %cst_6 [2] : vector<2x32x256xf32> to vector<2x32xf32>
    %7 = vector.shape_cast %6 : vector<2x32xf32> to vector<2x32x1xf32>
    %cst_7 = arith.constant dense<0.000000e+00> : vector<32x1xf32>
    %8 = vector.multi_reduction <add>, %4, %cst_7 [0] : vector<2x32x1xf32> to vector<32x1xf32>
    %9 = vector.shape_cast %8 : vector<32x1xf32> to vector<1x32x1xf32>
    %cst_8 = arith.constant 0.001953125 : f32
    %10 = vector.broadcast %cst_8 : f32 to vector<1x32x1xf32>
    %11 = arith.mulf %9, %10 : vector<1x32x1xf32>
    %cst_9 = arith.constant dense<0.000000e+00> : vector<32x1xf32>
    %12 = vector.multi_reduction <add>, %7, %cst_9 [0] : vector<2x32x1xf32> to vector<32x1xf32>
    %13 = vector.shape_cast %12 : vector<32x1xf32> to vector<1x32x1xf32>
    %cst_10 = arith.constant 0.001953125 : f32
    %14 = vector.broadcast %cst_10 : f32 to vector<1x32x1xf32>
    %15 = arith.mulf %13, %14 : vector<1x32x1xf32>
    %16 = arith.mulf %11, %11 : vector<1x32x1xf32>
    %17 = arith.subf %15, %16 : vector<1x32x1xf32>
    %18 = vector.broadcast %11 : vector<1x32x1xf32> to vector<2x32x256xf32>
    %19 = arith.subf %2, %18 : vector<2x32x256xf32>
    %cst_11 = arith.constant 9.99999974E-6 : f32
    %20 = vector.broadcast %cst_11 : f32 to vector<1x32x1xf32>
    %21 = arith.addf %17, %20 : vector<1x32x1xf32>
    %22 = math.rsqrt %21 : vector<1x32x1xf32>
    %23 = vector.broadcast %22 : vector<1x32x1xf32> to vector<2x32x256xf32>
    %24 = arith.mulf %19, %23 : vector<2x32x256xf32>
    %cst_12 = arith.constant 0.000000e+00 : f32
    %25 = vector.broadcast %cst_12 : f32 to vector<2x32x256xf32>
    %26 = arith.maximumf %24, %25 : vector<2x32x256xf32>
    %cst_13 = arith.constant dense<0.000000e+00> : vector<2x32xf32>
    %27 = vector.multi_reduction <add>, %26, %cst_13 [2] : vector<2x32x256xf32> to vector<2x32xf32>
    %28 = vector.shape_cast %27 : vector<2x32xf32> to vector<2x32x1xf32>
    %cst_14 = arith.constant 3.906250e-03 : f32
    %29 = vector.broadcast %cst_14 : f32 to vector<2x32x1xf32>
    %30 = arith.mulf %28, %29 : vector<2x32x1xf32>
    %31 = arith.mulf %26, %26 : vector<2x32x256xf32>
    %cst_15 = arith.constant dense<0.000000e+00> : vector<2x32xf32>
    %32 = vector.multi_reduction <add>, %31, %cst_15 [2] : vector<2x32x256xf32> to vector<2x32xf32>
    %33 = vector.shape_cast %32 : vector<2x32xf32> to vector<2x32x1xf32>
    %cst_16 = arith.constant 3.906250e-03 : f32
    %34 = vector.broadcast %cst_16 : f32 to vector<2x32x1xf32>
    %35 = arith.mulf %33, %34 : vector<2x32x1xf32>
    %36 = vector.broadcast %30 : vector<2x32x1xf32> to vector<2x32x256xf32>
    %37 = arith.subf %26, %36 : vector<2x32x256xf32>
    %38 = arith.mulf %30, %30 : vector<2x32x1xf32>
    %39 = arith.subf %35, %38 : vector<2x32x1xf32>
    %cst_17 = arith.constant 9.99999974E-6 : f32
    %40 = vector.broadcast %cst_17 : f32 to vector<2x32x1xf32>
    %41 = arith.addf %39, %40 : vector<2x32x1xf32>
    %42 = math.rsqrt %41 : vector<2x32x1xf32>
    %43 = vector.broadcast %42 : vector<2x32x1xf32> to vector<2x32x256xf32>
    %44 = arith.mulf %37, %43 : vector<2x32x256xf32>
    %c0_18 = arith.constant 0 : index
    %c0_19 = arith.constant 0 : index
    %c0_20 = arith.constant 0 : index
    %45 = vector.load %arg5[%c0_18, %c0_19, %c0_20] : memref<1x32x1xf32, #tpu.memory_space<vmem>>, vector<1x32x1xf32>
    %46 = vector.broadcast %45 : vector<1x32x1xf32> to vector<2x32x1xf32>
    %47 = arith.mulf %46, %30 : vector<2x32x1xf32>
    %cst_21 = arith.constant 1.000000e+00 : f32
    %48 = vector.broadcast %cst_21 : f32 to vector<1x32x1xf32>
    %49 = arith.subf %48, %45 : vector<1x32x1xf32>
    %50 = vector.broadcast %49 : vector<1x32x1xf32> to vector<2x32x256xf32>
    %51 = arith.mulf %50, %44 : vector<2x32x256xf32>
    %52 = vector.broadcast %47 : vector<2x32x1xf32> to vector<2x32x256xf32>
    %53 = arith.addf %52, %51 : vector<2x32x256xf32>
    %c0_22 = arith.constant 0 : index
    %c0_23 = arith.constant 0 : index
    %c0_24 = arith.constant 0 : index
    %54 = vector.load %arg3[%c0_22, %c0_23, %c0_24] : memref<1x32x1xf32, #tpu.memory_space<vmem>>, vector<1x32x1xf32>
    %55 = vector.broadcast %54 : vector<1x32x1xf32> to vector<2x32x256xf32>
    %56 = arith.mulf %55, %53 : vector<2x32x256xf32>
    %c0_25 = arith.constant 0 : index
    %c0_26 = arith.constant 0 : index
    %c0_27 = arith.constant 0 : index
    %57 = vector.load %arg4[%c0_25, %c0_26, %c0_27] : memref<1x32x1xf32, #tpu.memory_space<vmem>>, vector<1x32x1xf32>
    %58 = vector.broadcast %57 : vector<1x32x1xf32> to vector<2x32x256xf32>
    %59 = arith.addf %56, %58 : vector<2x32x256xf32>
    %60 = arith.negf %59 : vector<2x32x256xf32>
    %61 = math.exp %60 : vector<2x32x256xf32>
    %cst_28 = arith.constant 1.000000e+00 : f32
    %62 = vector.broadcast %cst_28 : f32 to vector<2x32x256xf32>
    %63 = arith.addf %62, %61 : vector<2x32x256xf32>
    %64 = arith.divf %62, %63 : vector<2x32x256xf32>
    %65 = arith.mulf %26, %64 : vector<2x32x256xf32>
    %66 = vector.extract_strided_slice %65 {offsets = [0, 0, 0], sizes = [2, 8, 256], strides = [1, 1, 1]} : vector<2x32x256xf32> to vector<2x8x256xf32>
    %67 = vector.extract_strided_slice %65 {offsets = [0, 8, 0], sizes = [2, 8, 256], strides = [1, 1, 1]} : vector<2x32x256xf32> to vector<2x8x256xf32>
    %68 = arith.addf %66, %67 : vector<2x8x256xf32>
    %69 = vector.extract_strided_slice %65 {offsets = [0, 16, 0], sizes = [2, 8, 256], strides = [1, 1, 1]} : vector<2x32x256xf32> to vector<2x8x256xf32>
    %70 = arith.addf %68, %69 : vector<2x8x256xf32>
    %71 = vector.extract_strided_slice %65 {offsets = [0, 24, 0], sizes = [2, 8, 256], strides = [1, 1, 1]} : vector<2x32x256xf32> to vector<2x8x256xf32>
    %72 = arith.addf %70, %71 : vector<2x8x256xf32>
    %c0_29 = arith.constant 0 : index
    %c0_30 = arith.constant 0 : index
    %c0_31 = arith.constant 0 : index
    %73 = vector.load %arg6[%c0_29, %c0_30, %c0_31] : memref<2x8x256xf32, #tpu.memory_space<vmem>>, vector<2x8x256xf32>
    tpu.vector_store %arg6[%c0_29, %c0_30, %c0_31], %72 {strides = array<i32>} : memref<2x8x256xf32, #tpu.memory_space<vmem>>, vector<2x8x256xf32>,
    return
  }
  func.func @transform_0(%arg0: i32) -> (i32, i32, i32) {
    %c0_i32 = arith.constant 0 : i32
    %c0_i32_0 = arith.constant 0 : i32
    %c0_i32_1 = arith.constant 0 : i32
    %c0_i32_2 = arith.constant 0 : i32
    return %c0_i32, %c0_i32_0, %c0_i32_1 : i32, i32, i32
  }
  func.func @transform_1(%arg0: i32) -> (i32, i32, i32) {
    %c0_i32 = arith.constant 0 : i32
    %c0_i32_0 = arith.constant 0 : i32
    %c0_i32_1 = arith.constant 0 : i32
    %c0_i32_2 = arith.constant 0 : i32
    return %c0_i32, %c0_i32_0, %c0_i32_1 : i32, i32, i32
  }
  func.func @transform_2(%arg0: i32) -> (i32, i32, i32) {
    %c0_i32 = arith.constant 0 : i32
    %c0_i32_0 = arith.constant 0 : i32
    %c0_i32_1 = arith.constant 0 : i32
    %c0_i32_2 = arith.constant 0 : i32
    return %c0_i32, %c0_i32_0, %c0_i32_1 : i32, i32, i32
  }
  func.func @transform_3(%arg0: i32) -> (i32, i32, i32) {
    %c0_i32 = arith.constant 0 : i32
    %c0_i32_0 = arith.constant 0 : i32
    %c0_i32_1 = arith.constant 0 : i32
    %c0_i32_2 = arith.constant 0 : i32
    return %c0_i32, %c0_i32_0, %c0_i32_1 : i32, i32, i32
  }
  func.func @transform_4(%arg0: i32) -> (i32, i32, i32) {
    %c0_i32 = arith.constant 0 : i32
    %c0_i32_0 = arith.constant 0 : i32
    %c0_i32_1 = arith.constant 0 : i32
    %c0_i32_2 = arith.constant 0 : i32
    return %c0_i32, %c0_i32_0, %c0_i32_1 : i32, i32, i32
  }
  func.func @transform_5(%arg0: i32) -> (i32, i32, i32) {
    %c0_i32 = arith.constant 0 : i32
    %c0_i32_0 = arith.constant 0 : i32
    %c0_i32_1 = arith.constant 0 : i32
    %c0_i32_2 = arith.constant 0 : i32
    return %c0_i32, %c0_i32_0, %c0_i32_1 : i32, i32, i32
  }
}

</mosaic_0001>

<bundles_post_ra>
// kernel: tpu_custom_call.1
= control target key start
LH: loop header
LB: loop body
LE: loop exit
PB: predicated region body
PF: predicated region fallthrough
CT: control target
= control target key end

     0   :  { %10 = vsyncpa [#allocation3], 0  ;;  %s1767_s0 = inlined_call_operand.hbm [shape: f32[2,256,256], index: 0, kind: input, shape index: {}]   ;;  %s1768_s1 = inlined_call_operand.hbm [shape: f32[2,32,256], index: 1, kind: input, shape index: {}]   ;;  %s1769_s2 = inlined_call_operand.vmem [shape: f32[1,32,1], index: 2, kind: input, shape index: {}]   ;;  %s1770_s3 = inlined_call_operand.vmem [shape: f32[1,32,1], index: 3, kind: input, shape index: {}]   ;;  %s1771_s4 = inlined_call_operand.vmem [shape: f32[1,32,1], index: 4, kind: input, shape index: {}]   ;;  %s1772_s5 = inlined_call_operand.hbm [shape: f32[2,8,256], index: 5, kind: output, shape index: {}]  }
   0x1   :  { %11 = vsyncpa [#allocation6], 0 }
   0x2   :  { %12 = vsyncpa [#allocation4], 0  ;;  %s1305_s18 = smov [#allocation2]   ;;  %s1233_s22 = scalar_lea.hbm %s1767_s0, 16384 }
   0x3   :  { %s18_s19 = sshll.u32 %s1305_s18, 4  ;;  %p1234_p0 = scmp.ne.s32.totalorder %s1767_s0, %s1233_s22  ;;  %s19_s19 = int_to_ptr.vmem [resolvable:$true] %s18_s19 }
   0x4   :  { %p1237_p1 = scmp.lt.u32.totalorder %s1233_s22, %s1767_s0 }
   0x6   :  { %p1239_p2 = pnand %p1237_p1, %p1234_p0 }
   0x8   :  { %1242 = shalt.err (!%p1239_p2)
}
   0x9   :  { %s1243_s27 = scalar_lea.vmem %s19_s19, 16384  ;;  %p1248_p4 = scmp.lt.s32.totalorder %s19_s19, %s19_s19 }
   0xa   :  { %p1244_p3 = scmp.ne.s32.totalorder %s19_s19, %s1243_s27  ;;  %p1249_p5 = scmp.lt.s32.totalorder %s1243_s27, %s1243_s27 }
   0xc   :  { %p1250_p6 = por %p1249_p5, %p1248_p4 }
   0xe   :  { %p1251_p7 = pnand %p1250_p6, %p1244_p3 }
  0x10   :  { %1254 = shalt.err (!%p1251_p7)
}
  0x11   :  { %s1306_s28 = smov 256   ;;  %s1307_s29 = smov 16  }
  0x12   :  { %24 = dma.hbm_to_vmem [thread:$0]  %s1767_s0, 16384, %s19_s19, [#allocation3], %s1306_s28, %s1306_s28, %s1307_s29  }
  0x13   :  { %s1308_s7 = smov [#allocation5]   ;;  %s1255_s11 = scalar_lea.hbm %s1768_s1, 2048 }
  0x14   :  { %s30_s8 = sshll.u32 %s1308_s7, 4  ;;  %p1256_p8 = scmp.ne.s32.totalorder %s1768_s1, %s1255_s11  ;;  %s31_s8 = int_to_ptr.vmem [resolvable:$true] %s30_s8 }
  0x15   :  { %p1259_p9 = scmp.lt.u32.totalorder %s1255_s11, %s1768_s1 }
  0x17   :  { %p1261_p10 = pnand %p1259_p9, %p1256_p8 }
  0x19   :  { %1264 = shalt.err (!%p1261_p10)
}
  0x1a   :  { %s1265_s16 = scalar_lea.vmem %s31_s8, 2048  ;;  %p1270_p12 = scmp.lt.s32.totalorder %s31_s8, %s31_s8 }
  0x1b   :  { %p1266_p11 = scmp.ne.s32.totalorder %s31_s8, %s1265_s16  ;;  %p1271_p13 = scmp.lt.s32.totalorder %s1265_s16, %s1265_s16 }
  0x1d   :  { %p1272_p0 = por %p1271_p13, %p1270_p12 }
  0x1f   :  { %p1273_p1 = pnand %p1272_p0, %p1266_p11 }
  0x21   :  { %1276 = shalt.err (!%p1273_p1)
}
  0x22   :  { %36 = dma.hbm_to_vmem [thread:$0]  %s1768_s1, 2048, %s31_s8, [#allocation6], %s1306_s28, %s1306_s28, %s1307_s29  }
  0x23   :  { %1299 = dma.done.wait [#allocation3], 16384  }
  0x24   :  { %1300 = vsyncadd [#allocation3], 4294950912 }
  0x25   :  { %1301 = dma.done.wait [#allocation6], 2048  }
  0x26   :  { %1302 = vsyncadd [#allocation6], 4294965248  ;;  %v66_v0 = vld [vmem:[#allocation2 + $0x8] sm:$0xff]  ;;  %v68_v1 = vld [vmem:[#allocation2 + $0x18] sm:$0xff] }
  0x27   :  { %v130_v2 = vld [vmem:[#allocation2 + $0x208] sm:$0xff]  ;;  %v1009_v3 = vpack.c.bf16 %v68_v1, %v66_v0  ;;  %v132_v4 = vld [vmem:[#allocation2 + $0x218] sm:$0xff]  ;;  %v65_v5 = vld [vmem:[#allocation2] sm:$0xff] }
  0x28   :  { %v67_v6 = vld [vmem:[#allocation2 + $0x10] sm:$0xff]  ;;  %v1073_v7 = vpack.c.bf16 %v132_v4, %v130_v2  ;;  %v129_v9 = vld [vmem:[#allocation2 + $0x200] sm:$0xff]  ;;  %v70_v11 = vld [vmem:[#allocation2 + $0x28] sm:$0xff] }
  0x29   :  { %v1011_v8 = vpack.c.bf16 %v67_v6, %v65_v5  ;;  %v131_v10 = vld [vmem:[#allocation2 + $0x210] sm:$0xff]  ;;  %1010 = vmatprep.subr.bf16.mxu0 %v1009_v3  ;;  %v72_v13 = vld [vmem:[#allocation2 + $0x38] sm:$0xff]  ;;  %v134_v14 = vld [vmem:[#allocation2 + $0x228] sm:$0xff] }
  0x2a   :  { %v1075_v12 = vpack.c.bf16 %v131_v10, %v129_v9  ;;  %v136_v15 = vld [vmem:[#allocation2 + $0x238] sm:$0xff]  ;;  %1074 = vmatprep.subr.bf16.mxu1 %v1073_v7  ;;  %v1013_v16 = vpack.c.bf16 %v72_v13, %v70_v11  ;;  %v69_v18 = vld [vmem:[#allocation2 + $0x20] sm:$0xff]  ;;  %v71_v19 = vld [vmem:[#allocation2 + $0x30] sm:$0xff] }
  0x2b   :  { %1012 = vmatpush1.bf16.msra.mxu0 %v1011_v8  ;;  %v1077_v17 = vpack.c.bf16 %v136_v15, %v134_v14  ;;  %v133_v20 = vld [vmem:[#allocation2 + $0x220] sm:$0xff]  ;;  %v1015_v21 = vpack.c.bf16 %v71_v19, %v69_v18  ;;  %v135_v22 = vld [vmem:[#allocation2 + $0x230] sm:$0xff]  ;;  %v74_v23 = vld [vmem:[#allocation2 + $0x48] sm:$0xff] }
  0x2c   :  { %1076 = vmatpush1.bf16.msra.mxu1 %v1075_v12  ;;  %v76_v24 = vld [vmem:[#allocation2 + $0x58] sm:$0xff]  ;;  %1014 = vmatprep.subr.bf16.mxu0 %v1013_v16  ;;  %v1079_v25 = vpack.c.bf16 %v135_v22, %v133_v20  ;;  %v138_v27 = vld [vmem:[#allocation2 + $0x248] sm:$0xff]  ;;  %v73_v29 = vld [vmem:[#allocation2 + $0x40] sm:$0xff] }
  0x2d   :  { %1078 = vmatprep.subr.bf16.mxu1 %v1077_v17  ;;  %v1017_v26 = vpack.c.bf16 %v76_v24, %v74_v23  ;;  %v140_v28 = vld [vmem:[#allocation2 + $0x258] sm:$0xff]  ;;  %v75_v31 = vld [vmem:[#allocation2 + $0x50] sm:$0xff]  ;;  %v137_v32 = vld [vmem:[#allocation2 + $0x240] sm:$0xff] }
  0x2e   :  { %v1081_v30 = vpack.c.bf16 %v140_v28, %v138_v27  ;;  %v139_v33 = vld [vmem:[#allocation2 + $0x250] sm:$0xff]  ;;  %v1019_v34 = vpack.c.bf16 %v75_v31, %v73_v29  ;;  %v78_v35 = vld [vmem:[#allocation2 + $0x68] sm:$0xff]  ;;  %v80_v36 = vld [vmem:[#allocation2 + $0x78] sm:$0xff] }
  0x2f   :  { %1016 = vmatpush1.bf16.msra.mxu0 %v1015_v21  ;;  %v142_v37 = vld [vmem:[#allocation2 + $0x268] sm:$0xff]  ;;  %v1083_v38 = vpack.c.bf16 %v139_v33, %v137_v32  ;;  %v1021_v39 = vpack.c.bf16 %v80_v36, %v78_v35  ;;  %v144_v40 = vld [vmem:[#allocation2 + $0x278] sm:$0xff]  ;;  %v77_v41 = vld [vmem:[#allocation2 + $0x60] sm:$0xff] }
  0x30   :  { %1080 = vmatpush1.bf16.msra.mxu1 %v1079_v25  ;;  %1018 = vmatprep.subr.bf16.mxu0 %v1017_v26  ;;  %v79_v42 = vld [vmem:[#allocation2 + $0x70] sm:$0xff]  ;;  %v1085_v43 = vpack.c.bf16 %v144_v40, %v142_v37  ;;  %v141_v44 = vld [vmem:[#allocation2 + $0x260] sm:$0xff]  ;;  %v82_v46 = vld [vmem:[#allocation2 + $0x88] sm:$0xff] }
  0x31   :  { %1082 = vmatprep.subr.bf16.mxu1 %v1081_v30  ;;  %v143_v45 = vld [vmem:[#allocation2 + $0x270] sm:$0xff]  ;;  %v84_v47 = vld [vmem:[#allocation2 + $0x98] sm:$0xff]  ;;  %v146_v48 = vld [vmem:[#allocation2 + $0x288] sm:$0xff]  ;;  %v1023_v50 = vpack.c.bf16 %v79_v42, %v77_v41 }
  0x32   :  { %v148_v49 = vld [vmem:[#allocation2 + $0x298] sm:$0xff]  ;;  %v1087_v51 = vpack.c.bf16 %v143_v45, %v141_v44  ;;  %v1025_v52 = vpack.c.bf16 %v84_v47, %v82_v46  ;;  %v81_v53 = vld [vmem:[#allocation2 + $0x80] sm:$0xff]  ;;  %v83_v54 = vld [vmem:[#allocation2 + $0x90] sm:$0xff] }
  0x33   :  { %1020 = vmatpush1.bf16.msra.mxu0 %v1019_v34  ;;  %v145_v55 = vld [vmem:[#allocation2 + $0x280] sm:$0xff]  ;;  %v1089_v56 = vpack.c.bf16 %v148_v49, %v146_v48  ;;  %v147_v57 = vld [vmem:[#allocation2 + $0x290] sm:$0xff]  ;;  %v86_v58 = vld [vmem:[#allocation2 + $0xa8] sm:$0xff]  ;;  %v1027_v62 = vpack.c.bf16 %v83_v54, %v81_v53 }
  0x34   :  { %1084 = vmatpush1.bf16.msra.mxu1 %v1083_v38  ;;  %1022 = vmatprep.subr.bf16.mxu0 %v1021_v39  ;;  %v88_v59 = vld [vmem:[#allocation2 + $0xb8] sm:$0xff]  ;;  %v150_v60 = vld [vmem:[#allocation2 + $0x2a8] sm:$0xff]  ;;  %v1091_v63 = vpack.c.bf16 %v147_v57, %v145_v55  ;;  %v85_v1 = vld [vmem:[#allocation2 + $0xa0] sm:$0xff] }
  0x35   :  { %1086 = vmatprep.subr.bf16.mxu1 %v1085_v43  ;;  %v152_v61 = vld [vmem:[#allocation2 + $0x2b8] sm:$0xff]  ;;  %v1029_v0 = vpack.c.bf16 %v88_v59, %v86_v58  ;;  %v87_v2 = vld [vmem:[#allocation2 + $0xb0] sm:$0xff]  ;;  %v149_v3 = vld [vmem:[#allocation2 + $0x2a0] sm:$0xff] }
  0x36   :  { %v1093_v4 = vpack.c.bf16 %v152_v61, %v150_v60  ;;  %v151_v5 = vld [vmem:[#allocation2 + $0x2b0] sm:$0xff]  ;;  %v90_v6 = vld [vmem:[#allocation2 + $0xc8] sm:$0xff]  ;;  %v92_v7 = vld [vmem:[#allocation2 + $0xd8] sm:$0xff]  ;;  %v1031_v10 = vpack.c.bf16 %v87_v2, %v85_v1 }
  0x37   :  { %1024 = vmatpush1.bf16.msra.mxu0 %v1023_v50  ;;  %v154_v8 = vld [vmem:[#allocation2 + $0x2c8] sm:$0xff]  ;;  %v156_v9 = vld [vmem:[#allocation2 + $0x2d8] sm:$0xff]  ;;  %v1095_v11 = vpack.c.bf16 %v151_v5, %v149_v3  ;;  %v1033_v12 = vpack.c.bf16 %v92_v7, %v90_v6  ;;  %v89_v13 = vld [vmem:[#allocation2 + $0xc0] sm:$0xff] }
  0x38   :  { %1088 = vmatpush1.bf16.msra.mxu1 %v1087_v51  ;;  %1026 = vmatprep.subr.bf16.mxu0 %v1025_v52  ;;  %v91_v14 = vld [vmem:[#allocation2 + $0xd0] sm:$0xff]  ;;  %v153_v15 = vld [vmem:[#allocation2 + $0x2c0] sm:$0xff]  ;;  %v1097_v16 = vpack.c.bf16 %v156_v9, %v154_v8  ;;  %v94_v18 = vld [vmem:[#allocation2 + $0xe8] sm:$0xff] }
  0x39   :  { %1090 = vmatprep.subr.bf16.mxu1 %v1089_v56  ;;  %v155_v17 = vld [vmem:[#allocation2 + $0x2d0] sm:$0xff]  ;;  %v96_v19 = vld [vmem:[#allocation2 + $0xf8] sm:$0xff]  ;;  %v158_v20 = vld [vmem:[#allocation2 + $0x2e8] sm:$0xff]  ;;  %v1035_v22 = vpack.c.bf16 %v91_v14, %v89_v13 }
  0x3a   :  { %v160_v21 = vld [vmem:[#allocation2 + $0x2f8] sm:$0xff]  ;;  %v1099_v23 = vpack.c.bf16 %v155_v17, %v153_v15  ;;  %v1037_v24 = vpack.c.bf16 %v96_v19, %v94_v18  ;;  %v93_v25 = vld [vmem:[#allocation2 + $0xe0] sm:$0xff]  ;;  %v95_v26 = vld [vmem:[#allocation2 + $0xf0] sm:$0xff] }
  0x3b   :  { %1028 = vmatpush1.bf16.msra.mxu0 %v1027_v62  ;;  %v157_v27 = vld [vmem:[#allocation2 + $0x2e0] sm:$0xff]  ;;  %v1101_v28 = vpack.c.bf16 %v160_v21, %v158_v20  ;;  %v159_v29 = vld [vmem:[#allocation2 + $0x2f0] sm:$0xff]  ;;  %v98_v30 = vld [vmem:[#allocation2 + $0x108] sm:$0xff]  ;;  %v1039_v34 = vpack.c.bf16 %v95_v26, %v93_v25 }
  0x3c   :  { %1092 = vmatpush1.bf16.msra.mxu1 %v1091_v63  ;;  %1030 = vmatprep.subr.bf16.mxu0 %v1029_v0  ;;  %v100_v31 = vld [vmem:[#allocation2 + $0x118] sm:$0xff]  ;;  %v162_v32 = vld [vmem:[#allocation2 + $0x308] sm:$0xff]  ;;  %v1103_v35 = vpack.c.bf16 %v159_v29, %v157_v27  ;;  %v97_v37 = vld [vmem:[#allocation2 + $0x100] sm:$0xff] }
  0x3d   :  { %1094 = vmatprep.subr.bf16.mxu1 %v1093_v4  ;;  %v164_v33 = vld [vmem:[#allocation2 + $0x318] sm:$0xff]  ;;  %v1041_v36 = vpack.c.bf16 %v100_v31, %v98_v30  ;;  %v99_v38 = vld [vmem:[#allocation2 + $0x110] sm:$0xff]  ;;  %v161_v39 = vld [vmem:[#allocation2 + $0x300] sm:$0xff] }
  0x3e   :  { %v1105_v40 = vpack.c.bf16 %v164_v33, %v162_v32  ;;  %v163_v41 = vld [vmem:[#allocation2 + $0x310] sm:$0xff]  ;;  %v102_v42 = vld [vmem:[#allocation2 + $0x128] sm:$0xff]  ;;  %v104_v43 = vld [vmem:[#allocation2 + $0x138] sm:$0xff]  ;;  %v1043_v46 = vpack.c.bf16 %v99_v38, %v97_v37 }
  0x3f   :  { %1032 = vmatpush1.bf16.msra.mxu0 %v1031_v10  ;;  %v166_v44 = vld [vmem:[#allocation2 + $0x328] sm:$0xff]  ;;  %v168_v45 = vld [vmem:[#allocation2 + $0x338] sm:$0xff]  ;;  %v1107_v47 = vpack.c.bf16 %v163_v41, %v161_v39  ;;  %v1045_v48 = vpack.c.bf16 %v104_v43, %v102_v42  ;;  %v101_v49 = vld [vmem:[#allocation2 + $0x120] sm:$0xff] }
  0x40   :  { %1096 = vmatpush1.bf16.msra.mxu1 %v1095_v11  ;;  %1034 = vmatprep.subr.bf16.mxu0 %v1033_v12  ;;  %v103_v50 = vld [vmem:[#allocation2 + $0x130] sm:$0xff]  ;;  %v165_v51 = vld [vmem:[#allocation2 + $0x320] sm:$0xff]  ;;  %v1109_v52 = vpack.c.bf16 %v168_v45, %v166_v44  ;;  %v106_v54 = vld [vmem:[#allocation2 + $0x148] sm:$0xff] }
  0x41   :  { %1098 = vmatprep.subr.bf16.mxu1 %v1097_v16  ;;  %v167_v53 = vld [vmem:[#allocation2 + $0x330] sm:$0xff]  ;;  %v108_v55 = vld [vmem:[#allocation2 + $0x158] sm:$0xff]  ;;  %v170_v56 = vld [vmem:[#allocation2 + $0x348] sm:$0xff]  ;;  %v1047_v58 = vpack.c.bf16 %v103_v50, %v101_v49 }
  0x42   :  { %v172_v57 = vld [vmem:[#allocation2 + $0x358] sm:$0xff]  ;;  %v1111_v59 = vpack.c.bf16 %v167_v53, %v165_v51  ;;  %v1049_v60 = vpack.c.bf16 %v108_v55, %v106_v54  ;;  %v105_v61 = vld [vmem:[#allocation2 + $0x140] sm:$0xff]  ;;  %v107_v62 = vld [vmem:[#allocation2 + $0x150] sm:$0xff] }
  0x43   :  { %1036 = vmatpush1.bf16.msra.mxu0 %v1035_v22  ;;  %v169_v63 = vld [vmem:[#allocation2 + $0x340] sm:$0xff]  ;;  %v1113_v0 = vpack.c.bf16 %v172_v57, %v170_v56  ;;  %v171_v1 = vld [vmem:[#allocation2 + $0x350] sm:$0xff]  ;;  %v110_v2 = vld [vmem:[#allocation2 + $0x168] sm:$0xff]  ;;  %v1051_v6 = vpack.c.bf16 %v107_v62, %v105_v61 }
  0x44   :  { %1100 = vmatpush1.bf16.msra.mxu1 %v1099_v23  ;;  %1038 = vmatprep.subr.bf16.mxu0 %v1037_v24  ;;  %v112_v3 = vld [vmem:[#allocation2 + $0x178] sm:$0xff]  ;;  %v174_v4 = vld [vmem:[#allocation2 + $0x368] sm:$0xff]  ;;  %v109_v7 = vld [vmem:[#allocation2 + $0x160] sm:$0xff]  ;;  %v1115_v8 = vpack.c.bf16 %v171_v1, %v169_v63 }
  0x45   :  { %1102 = vmatprep.subr.bf16.mxu1 %v1101_v28  ;;  %v176_v5 = vld [vmem:[#allocation2 + $0x378] sm:$0xff]  ;;  %v1053_v9 = vpack.c.bf16 %v112_v3, %v110_v2  ;;  %v111_v10 = vld [vmem:[#allocation2 + $0x170] sm:$0xff]  ;;  %v173_v11 = vld [vmem:[#allocation2 + $0x360] sm:$0xff] }
  0x46   :  { %v175_v12 = vld [vmem:[#allocation2 + $0x370] sm:$0xff]  ;;  %v1117_v13 = vpack.c.bf16 %v176_v5, %v174_v4  ;;  %v114_v14 = vld [vmem:[#allocation2 + $0x188] sm:$0xff]  ;;  %v116_v15 = vld [vmem:[#allocation2 + $0x198] sm:$0xff]  ;;  %v1055_v20 = vpack.c.bf16 %v111_v10, %v109_v7 }
  0x47   :  { %1040 = vmatpush1.bf16.msra.mxu0 %v1039_v34  ;;  %v50_v16 = vld [vmem:[#allocation5 + $0x8] sm:$0xff]  ;;  %v180_v18 = vld [vmem:[#allocation2 + $0x398] sm:$0xff]  ;;  %v1119_v21 = vpack.c.bf16 %v175_v12, %v173_v11  ;;  %v1057_v22 = vpack.c.bf16 %v116_v15, %v114_v14  ;;  %v113_v23 = vld [vmem:[#allocation2 + $0x180] sm:$0xff] }
  0x48   :  { %1104 = vmatpush1.bf16.msra.mxu1 %v1103_v35  ;;  %1042 = vmatprep.subr.bf16.mxu0 %v1041_v36  ;;  %v178_v17 = vld [vmem:[#allocation2 + $0x388] sm:$0xff]  ;;  %v115_v24 = vld [vmem:[#allocation2 + $0x190] sm:$0xff]  ;;  %v177_v25 = vld [vmem:[#allocation2 + $0x380] sm:$0xff] }
  0x49   :  { %1106 = vmatprep.subr.bf16.mxu1 %v1105_v40  ;;  %257 = vmatprep.mubr.f32.mxu0 %v50_v16  ;;  %v58_v19 = vld [vmem:[#allocation5 + $0x48] sm:$0xff]  ;;  %v1121_v26 = vpack.c.bf16 %v180_v18, %v178_v17  ;;  %v179_v27 = vld [vmem:[#allocation2 + $0x390] sm:$0xff]  ;;  %v120_v29 = vld [vmem:[#allocation2 + $0x1b8] sm:$0xff]  ;;  %v1059_v32 = vpack.c.bf16 %v115_v24, %v113_v23  ;;  %v1309_v16 = vmov 0  }
  0x4a   :  { %346 = vmatprep.mubr.f32.mxu1 %v58_v19  ;;  %v118_v28 = vld [vmem:[#allocation2 + $0x1a8] sm:$0xff]  ;;  %v184_v31 = vld [vmem:[#allocation2 + $0x3b8] sm:$0xff]  ;;  %v1123_v33 = vpack.c.bf16 %v179_v27, %v177_v25  ;;  %v117_v35 = vld [vmem:[#allocation2 + $0x1a0] sm:$0xff]  ;;  %1144 = vset.pattern.permute.xlu1 %v1309_v16 }
  0x4b   :  { %1044 = vmatpush1.bf16.msra.mxu0 %v1043_v46  ;;  %v182_v30 = vld [vmem:[#allocation2 + $0x3a8] sm:$0xff]  ;;  %v1061_v34 = vpack.c.bf16 %v120_v29, %v118_v28  ;;  %v119_v36 = vld [vmem:[#allocation2 + $0x1b0] sm:$0xff]  ;;  %v181_v37 = vld [vmem:[#allocation2 + $0x3a0] sm:$0xff]  ;;  %1143 = vset.pattern.permute.xlu0 %v1309_v16 }
  0x4c   :  { %1108 = vmatpush1.bf16.msra.mxu1 %v1107_v47  ;;  %1046 = vmatprep.subr.bf16.mxu0 %v1045_v48  ;;  %v1125_v38 = vpack.c.bf16 %v184_v31, %v182_v30  ;;  %v183_v39 = vld [vmem:[#allocation2 + $0x3b0] sm:$0xff]  ;;  %v122_v40 = vld [vmem:[#allocation2 + $0x1c8] sm:$0xff]  ;;  %v124_v41 = vld [vmem:[#allocation2 + $0x1d8] sm:$0xff]  ;;  %v1063_v44 = vpack.c.bf16 %v119_v36, %v117_v35 }
  0x4d   :  { %1110 = vmatprep.subr.bf16.mxu1 %v1109_v52  ;;  %v186_v42 = vld [vmem:[#allocation2 + $0x3c8] sm:$0xff]  ;;  %v188_v43 = vld [vmem:[#allocation2 + $0x3d8] sm:$0xff]  ;;  %v1127_v45 = vpack.c.bf16 %v183_v39, %v181_v37  ;;  %v1065_v46 = vpack.c.bf16 %v124_v41, %v122_v40  ;;  %v121_v47 = vld [vmem:[#allocation2 + $0x1c0] sm:$0xff] }
  0x4e   :  { %v123_v48 = vld [vmem:[#allocation2 + $0x1d0] sm:$0xff]  ;;  %v185_v49 = vld [vmem:[#allocation2 + $0x3c0] sm:$0xff]  ;;  %v1129_v50 = vpack.c.bf16 %v188_v43, %v186_v42  ;;  %v126_v52 = vld [vmem:[#allocation2 + $0x1e8] sm:$0xff] }
  0x4f   :  { %1048 = vmatpush1.bf16.msra.mxu0 %v1047_v58  ;;  %v187_v51 = vld [vmem:[#allocation2 + $0x3d0] sm:$0xff]  ;;  %v128_v53 = vld [vmem:[#allocation2 + $0x1f8] sm:$0xff]  ;;  %v190_v54 = vld [vmem:[#allocation2 + $0x3e8] sm:$0xff]  ;;  %v1067_v56 = vpack.c.bf16 %v123_v48, %v121_v47 }
  0x50   :  { %1112 = vmatpush1.bf16.msra.mxu1 %v1111_v59  ;;  %1050 = vmatprep.subr.bf16.mxu0 %v1049_v60  ;;  %v192_v55 = vld [vmem:[#allocation2 + $0x3f8] sm:$0xff]  ;;  %v1131_v57 = vpack.c.bf16 %v187_v51, %v185_v49  ;;  %v1069_v58 = vpack.c.bf16 %v128_v53, %v126_v52  ;;  %v125_v59 = vld [vmem:[#allocation2 + $0x1e0] sm:$0xff]  ;;  %v127_v60 = vld [vmem:[#allocation2 + $0x1f0] sm:$0xff] }
  0x51   :  { %1114 = vmatprep.subr.bf16.mxu1 %v1113_v0  ;;  %v1133_v61 = vpack.c.bf16 %v192_v55, %v190_v54  ;;  %v189_v62 = vld [vmem:[#allocation2 + $0x3e0] sm:$0xff]  ;;  %v191_v63 = vld [vmem:[#allocation2 + $0x3f0] sm:$0xff]  ;;  %v1071_v0 = vpack.c.bf16 %v127_v60, %v125_v59  ;;  %v52_v4 = vld [vmem:[#allocation5 + $0x18] sm:$0xff] }
  0x52   :  { %v1135_v1 = vpack.c.bf16 %v191_v63, %v189_v62  ;;  %v49_v2 = vld [vmem:[#allocation5] sm:$0xff]  ;;  %v60_v5 = vld [vmem:[#allocation5 + $0x58] sm:$0xff]  ;;  %v59_v7 = vld [vmem:[#allocation5 + $0x50] sm:$0xff] }
  0x53   :  { %1052 = vmatpush1.bf16.msra.mxu0 %v1051_v6  ;;  %v57_v3 = vld [vmem:[#allocation5 + $0x40] sm:$0xff]  ;;  %v51_v6 = vld [vmem:[#allocation5 + $0x10] sm:$0xff]  ;;  %v56_v12 = vld [vmem:[#allocation5 + $0x38] sm:$0xff] }
  0x54   :  { %1116 = vmatpush1.bf16.msra.mxu1 %v1115_v8  ;;  %1054 = vmatprep.subr.bf16.mxu0 %v1053_v9  ;;  %v54_v8 = vld [vmem:[#allocation5 + $0x28] sm:$0xff]  ;;  %v53_v10 = vld [vmem:[#allocation5 + $0x20] sm:$0xff]  ;;  %v55_v14 = vld [vmem:[#allocation5 + $0x30] sm:$0xff] }
  0x55   :  { %1118 = vmatprep.subr.bf16.mxu1 %v1117_v13  ;;  %v62_v9 = vld [vmem:[#allocation5 + $0x68] sm:$0xff]  ;;  %v61_v11 = vld [vmem:[#allocation5 + $0x60] sm:$0xff]  ;;  %v64_v13 = vld [vmem:[#allocation5 + $0x78] sm:$0xff] }
  0x56   :  { %v63_v15 = vld [vmem:[#allocation5 + $0x70] sm:$0xff] }
  0x57   :  { %1056 = vmatpush1.bf16.msra.mxu0 %v1055_v20 }
  0x58   :  { %1120 = vmatpush1.bf16.msra.mxu1 %v1119_v21  ;;  %1058 = vmatprep.subr.bf16.mxu0 %v1057_v22 }
  0x59   :  { %1122 = vmatprep.subr.bf16.mxu1 %v1121_v26 }
  0x5b   :  { %1060 = vmatpush1.bf16.msra.mxu0 %v1059_v32 }
  0x5c   :  { %1124 = vmatpush1.bf16.msra.mxu1 %v1123_v33  ;;  %1062 = vmatprep.subr.bf16.mxu0 %v1061_v34 }
  0x5d   :  { %1126 = vmatprep.subr.bf16.mxu1 %v1125_v38 }
  0x5f   :  { %1064 = vmatpush1.bf16.msra.mxu0 %v1063_v44 }
  0x60   :  { %1128 = vmatpush1.bf16.msra.mxu1 %v1127_v45  ;;  %1066 = vmatprep.subr.bf16.mxu0 %v1065_v46 }
  0x61   :  { %1130 = vmatprep.subr.bf16.mxu1 %v1129_v50 }
  0x63   :  { %1068 = vmatpush1.bf16.msra.mxu0 %v1067_v56 }
  0x64   :  { %1132 = vmatpush1.bf16.msra.mxu1 %v1131_v57  ;;  %1070 = vmatprep.subr.bf16.mxu0 %v1069_v58 }
  0x65   :  { %1134 = vmatprep.subr.bf16.mxu1 %v1133_v61 }
  0x67   :  { %1072 = vmatpush1.bf16.msra.mxu0 %v1071_v0 }
  0x68   :  { %1136 = vmatpush1.bf16.msra.mxu1 %v1135_v1  ;;  %v1454_v1 = vld [vmem:[%s1771_s4 + $0x8] sm:$0xff] }
  0x6a   :  { %258 = vmatmul.mubr.f32.vlgmr.msra.gmra.mrb[0].mxu0 %v49_v2  ;;  %v672_v2 = vsub.f32 1.0, %v1454_v1 }
  0x6b   :  { %347 = vmatmul.mubr.f32.vlgmr.msra.gmra.mrb[0].mxu1 %v57_v3  ;;  %263 = vmatprep.mubr.f32.mxu0 %v52_v4  ;;  %v1460_v3 = vld [vmem:[%s1771_s4 + $0x10] sm:$0xff] }
  0x6c   :  { %352 = vmatprep.mubr.f32.mxu1 %v60_v5  ;;  %v673_v4 = vsub.f32 1.0, %v1460_v3  ;;  %v1466_v5 = vld [vmem:[%s1771_s4 + $0x18] sm:$0xff] }
  0x6e   :  { %264 = vmatmul.mubr.f32.gmra.mrb[2].mxu0 %v51_v6  ;;  %v1471_v6 = vld [vmem:[%s1771_s4] sm:$0xff] }
  0x6f   :  { %353 = vmatmul.mubr.f32.gmra.mrb[2].mxu1 %v59_v7  ;;  %269 = vmatprep.mubr.f32.mxu0 %v54_v8  ;;  %v674_v7 = vsub.f32 1.0, %v1466_v5  ;;  %v671_v8 = vsub.f32 1.0, %v1471_v6 }
  0x70   :  { %358 = vmatprep.mubr.f32.mxu1 %v62_v9  ;;  %v767_v9 = vld [vmem:[%s1769_s2] sm:$0xff] }
  0x72   :  { %270 = vmatmul.mubr.f32.gmra.mrb[4].mxu0 %v53_v10  ;;  %v768_v10 = vld [vmem:[%s1769_s2 + $0x8] sm:$0xff] }
  0x73   :  { %359 = vmatmul.mubr.f32.gmra.mrb[4].mxu1 %v61_v11  ;;  %275 = vmatprep.mubr.f32.mxu0 %v56_v12  ;;  %v807_v11 = vld [vmem:[%s1770_s3] sm:$0xff]  ;;  %v769_v12 = vld [vmem:[%s1769_s2 + $0x10] sm:$0xff] }
  0x74   :  { %364 = vmatprep.mubr.f32.mxu1 %v64_v13 }
  0x76   :  { %276 = vmatmul.mubr.f32.gmra.mrb[6].mxu0 %v55_v14 }
  0x77   :  { %365 = vmatmul.mubr.f32.gmra.mrb[6].mxu1 %v63_v15 }
 0x13d   :  { %v1371_v17 = vpop.f32.mrb[0].mxu0 }
 0x13e   :  { %v1373_v18 = vpop.f32.mrb[0].mxu1  ;;  %v1375_v19 = vpop.f32.mrb[1].mxu0  ;;  %v395_v20 = vmul.f32 %v1371_v17, %v1371_v17 }
 0x13f   :  { %v1379_v21 = vpop.f32.mrb[1].mxu1  ;;  %v371_v22 = vadd.f32 %v1375_v19, %v1371_v17  ;;  %v396_v23 = vmul.f32 %v1375_v19, %v1375_v19  ;;  %v403_v24 = vmul.f32 %v1373_v18, %v1373_v18 }
 0x140   :  { %v383_v25 = vadd.f32 %v1379_v21, %v1373_v18  ;;  %v404_v26 = vmul.f32 %v1379_v21, %v1379_v21 }
 0x141   :  { %372 = vadd.xlane.f32.xlu0 %v371_v22  ;;  %v1391_v27 = vpop.f32.mrb[2].mxu0  ;;  %v411_v28 = vadd.f32 %v396_v23, %v395_v20 }
 0x142   :  { %384 = vadd.xlane.f32.xlu1 %v383_v25  ;;  %v1393_v29 = vpop.f32.mrb[2].mxu1  ;;  %v1395_v30 = vpop.f32.mrb[3].mxu0  ;;  %v423_v31 = vadd.f32 %v404_v26, %v403_v24  ;;  %v397_v32 = vmul.f32 %v1391_v27, %v1391_v27 }
 0x143   :  { %v1399_v33 = vpop.f32.mrb[3].mxu1  ;;  %v398_v34 = vmul.f32 %v1395_v30, %v1395_v30  ;;  %v405_v35 = vmul.f32 %v1393_v29, %v1393_v29  ;;  %v374_v36 = vadd.f32 %v1395_v30, %v1391_v27 }
 0x144   :  { %v386_v37 = vadd.f32 %v1399_v33, %v1393_v29  ;;  %v406_v38 = vmul.f32 %v1399_v33, %v1399_v33 }
 0x145   :  { %412 = vadd.xlane.f32.xlu0 %v411_v28  ;;  %v414_v39 = vadd.f32 %v398_v34, %v397_v32  ;;  %v1411_v40 = vpop.f32.mrb[4].mxu0 }
 0x146   :  { %387 = vadd.xlane.f32.xlu1 %v386_v37  ;;  %v1413_v41 = vpop.f32.mrb[4].mxu1  ;;  %v426_v42 = vadd.f32 %v406_v38, %v405_v35  ;;  %v1415_v43 = vpop.f32.mrb[5].mxu0  ;;  %v399_v44 = vmul.f32 %v1411_v40, %v1411_v40 }
 0x147   :  { %v1419_v45 = vpop.f32.mrb[5].mxu1  ;;  %v377_v46 = vadd.f32 %v1415_v43, %v1411_v40  ;;  %v407_v47 = vmul.f32 %v1413_v41, %v1413_v41  ;;  %v400_v48 = vmul.f32 %v1415_v43, %v1415_v43 }
 0x148   :  { %v389_v49 = vadd.f32 %v1419_v45, %v1413_v41  ;;  %v408_v50 = vmul.f32 %v1419_v45, %v1419_v45 }
 0x149   :  { %424 = vadd.xlane.f32.xlu0 %v423_v31  ;;  %v417_v51 = vadd.f32 %v400_v48, %v399_v44  ;;  %v1431_v52 = vpop.f32.mrb[6].mxu0 }
 0x14a   :  { %415 = vadd.xlane.f32.xlu1 %v414_v39  ;;  %v1433_v53 = vpop.f32.mrb[6].mxu1  ;;  %v429_v54 = vadd.f32 %v408_v50, %v407_v47  ;;  %v1435_v55 = vpop.f32.mrb[7].mxu0  ;;  %v401_v56 = vmul.f32 %v1431_v52, %v1431_v52 }
 0x14b   :  { %v1439_v57 = vpop.f32.mrb[7].mxu1  ;;  %v402_v58 = vmul.f32 %v1435_v55, %v1435_v55  ;;  %v380_v59 = vadd.f32 %v1435_v55, %v1431_v52  ;;  %v409_v60 = vmul.f32 %v1433_v53, %v1433_v53 }
 0x14c   :  { %v410_v61 = vmul.f32 %v1439_v57, %v1439_v57  ;;  %v392_v62 = vadd.f32 %v1439_v57, %v1433_v53 }
 0x14d   :  { %375 = vadd.xlane.f32.xlu0 %v374_v36  ;;  %v420_v63 = vadd.f32 %v402_v58, %v401_v56 }
 0x14e   :  { %427 = vadd.xlane.f32.xlu1 %v426_v42  ;;  %v432_v0 = vadd.f32 %v410_v61, %v409_v60 }
 0x151   :  { %378 = vadd.xlane.f32.xlu0 %v377_v46 }
 0x152   :  { %390 = vadd.xlane.f32.xlu1 %v389_v49 }
 0x155   :  { %418 = vadd.xlane.f32.xlu0 %v417_v51 }
 0x156   :  { %430 = vadd.xlane.f32.xlu1 %v429_v54 }
 0x159   :  { %381 = vadd.xlane.f32.xlu0 %v380_v59 }
 0x15a   :  { %393 = vadd.xlane.f32.xlu1 %v392_v62 }
 0x15d   :  { %421 = vadd.xlane.f32.xlu0 %v420_v63 }
 0x16b   :  { %682 = vperm.xlu1 %1144, %v672_v2  }
 0x16f   :  { %687 = vperm.xlu1 %1144, %v673_v4  }
 0x173   :  { %692 = vperm.xlu1 %1144, %v674_v7   ;;  %677 = vperm.xlu0 %1143, %v671_v8  }
 0x177   :  { %773 = vperm.xlu1 %1144, %v767_v9   ;;  %778 = vperm.xlu0 %1143, %v768_v10  }
 0x17b   :  { %813 = vperm.xlu0 %1143, %v807_v11  }
 0x19b   :  { %433 = vadd.xlane.f32.xlu1 %v432_v0 }
 0x1ac   :  { %783 = vperm.xlu1 %1144, %v769_v12  }
 0x1ce   :  { %v373_v13 = vpop.xlane.xlu0 %372 }
 0x1cf   :  { %v385_v14 = vpop.xlane.xlu1 %384 }
 0x1d0   :  { %v435_v15 = vadd.f32 %v385_v14, %v373_v13 }
 0x1d2   :  { %v413_v16 = vpop.xlane.xlu0 %412  ;;  %v439_v22 = vmul.f32 0.001953125, %v435_v15 }
 0x1d3   :  { %v388_v20 = vpop.xlane.xlu1 %387 }
 0x1d4   :  { %v451_v26 = vmul.f32 %v439_v22, %v439_v22  ;;  %v459_v61 = vsub.f32 %v1371_v17, %v439_v22  ;;  %v460_v62 = vsub.f32 %v1375_v19, %v439_v22  ;;  %v467_v0 = vsub.f32 %v1373_v18, %v439_v22 }
 0x1d5   :  { %v468_v2 = vsub.f32 %v1379_v21, %v439_v22 }
 0x1d6   :  { %v425_v23 = vpop.xlane.xlu0 %424 }
 0x1d7   :  { %v443_v24 = vadd.f32 %v425_v23, %v413_v16  ;;  %v416_v25 = vpop.xlane.xlu1 %415 }
 0x1d9   :  { %v447_v28 = vmul.f32 0.001953125, %v443_v24 }
 0x1da   :  { %v376_v31 = vpop.xlane.xlu0 %375 }
 0x1db   :  { %v455_v32 = vsub.f32 %v447_v28, %v451_v26  ;;  %v428_v34 = vpop.xlane.xlu1 %427  ;;  %v436_v35 = vadd.f32 %v388_v20, %v376_v31 }
 0x1dc   :  { %v444_v36 = vadd.f32 %v428_v34, %v416_v25 }
 0x1dd   :  { %v475_v37 = vadd.f32 1e-05, %v455_v32  ;;  %v440_v38 = vmul.f32 0.001953125, %v436_v35 }
 0x1de   :  { %v379_v39 = vpop.xlane.xlu0 %378  ;;  %v448_v42 = vmul.f32 0.001953125, %v444_v36 }
 0x1df   :  { %1145 = vrsqrt.f32 %v475_v37  ;;  %v452_v44 = vmul.f32 %v440_v38, %v440_v38  ;;  %v391_v46 = vpop.xlane.xlu1 %390  ;;  %v461_v13 = vsub.f32 %v1391_v27, %v440_v38  ;;  %v462_v17 = vsub.f32 %v1395_v30, %v440_v38 }
 0x1e0   :  { %v437_v47 = vadd.f32 %v391_v46, %v379_v39  ;;  %v469_v14 = vsub.f32 %v1393_v29, %v440_v38  ;;  %v470_v16 = vsub.f32 %v1399_v33, %v440_v38 }
 0x1e1   :  { %v456_v48 = vsub.f32 %v448_v42, %v452_v44 }
 0x1e2   :  { %v1487_v49 = vmul.f32 0.001953125, %v437_v47  ;;  %v419_v50 = vpop.xlane.xlu0 %418 }
 0x1e3   :  { %v476_v51 = vadd.f32 1e-05, %v456_v48  ;;  %v431_v54 = vpop.xlane.xlu1 %430 }
 0x1e4   :  { %v445_v56 = vadd.f32 %v431_v54, %v419_v50  ;;  %v453_v58 = vmul.f32 %v1487_v49, %v1487_v49  ;;  %v463_v32 = vsub.f32 %v1411_v40, %v1487_v49  ;;  %v464_v34 = vsub.f32 %v1415_v43, %v1487_v49 }
 0x1e5   :  { %1147 = vrsqrt.f32 %v476_v51  ;;  %v471_v46 = vsub.f32 %v1413_v41, %v1487_v49  ;;  %v472_v51 = vsub.f32 %v1419_v45, %v1487_v49 }
 0x1e6   :  { %v449_v59 = vmul.f32 0.001953125, %v445_v56 }
 0x1e8   :  { %v457_v60 = vsub.f32 %v449_v59, %v453_v58 }
 0x1e9   :  { %v1146_v63 = vpop.eup %1145 }
 0x1ea   :  { %v477_v4 = vadd.f32 1e-05, %v457_v60  ;;  %v483_v7 = vmul.f32 %v1146_v63, %v459_v61  ;;  %v484_v8 = vmul.f32 %v1146_v63, %v460_v62  ;;  %v491_v9 = vmul.f32 %v1146_v63, %v467_v0 }
 0x1eb   :  { %v492_v10 = vmul.f32 %v1146_v63, %v468_v2 }
 0x1ec   :  { %1149 = vrsqrt.f32 %v477_v4  ;;  %v1495_v11 = vmax.f32 %v483_v7, 0.0  ;;  %v1497_v12 = vmax.f32 %v484_v8, 0.0  ;;  %v1503_v18 = vmax.f32 %v491_v9, 0.0  ;;  %v394_v9 = vpop.xlane.xlu1 %393 }
 0x1ed   :  { %v1505_v21 = vmax.f32 %v492_v10, 0.0 }
 0x1ee   :  { %v515_v19 = vadd.f32 %v1497_v12, %v1495_v11  ;;  %v547_v27 = vmul.f32 %v1495_v11, %v1495_v11  ;;  %v548_v29 = vmul.f32 %v1497_v12, %v1497_v12  ;;  %v555_v37 = vmul.f32 %v1503_v18, %v1503_v18 }
 0x1ef   :  { %v1148_v15 = vpop.eup %1147  ;;  %v527_v24 = vadd.f32 %v1505_v21, %v1503_v18  ;;  %v556_v38 = vmul.f32 %v1505_v21, %v1505_v21 }
 0x1f0   :  { %516 = vadd.xlane.f32.xlu0 %v515_v19  ;;  %v485_v20 = vmul.f32 %v1148_v15, %v461_v13  ;;  %v486_v22 = vmul.f32 %v1148_v15, %v462_v17  ;;  %v493_v23 = vmul.f32 %v1148_v15, %v469_v14  ;;  %v494_v30 = vmul.f32 %v1148_v15, %v470_v16  ;;  %v1567_v10 = vpop.permute.xlu1 %682  ;;  %v382_v19 = vpop.xlane.xlu0 %381 }
 0x1f1   :  { %v563_v36 = vadd.f32 %v548_v29, %v547_v27  ;;  %v575_v47 = vadd.f32 %v556_v38, %v555_v37  ;;  %v438_v14 = vadd.f32 %v394_v9, %v382_v19 }
 0x1f2   :  { %v1513_v25 = vmax.f32 %v485_v20, 0.0  ;;  %v1515_v26 = vmax.f32 %v486_v22, 0.0  ;;  %v1521_v28 = vmax.f32 %v493_v23, 0.0  ;;  %v1523_v31 = vmax.f32 %v494_v30, 0.0 }
 0x1f3   :  { %v442_v16 = vmul.f32 0.001953125, %v438_v14 }
 0x1f4   :  { %528 = vadd.xlane.f32.xlu0 %v527_v24  ;;  %v518_v33 = vadd.f32 %v1515_v26, %v1513_v25  ;;  %v530_v44 = vadd.f32 %v1523_v31, %v1521_v28  ;;  %v549_v40 = vmul.f32 %v1513_v25, %v1513_v25  ;;  %v550_v43 = vmul.f32 %v1515_v26, %v1515_v26  ;;  %v1569_v13 = vpop.permute.xlu1 %687  ;;  %v422_v20 = vpop.xlane.xlu0 %421 }
 0x1f5   :  { %v557_v54 = vmul.f32 %v1521_v28, %v1521_v28  ;;  %v558_v58 = vmul.f32 %v1523_v31, %v1523_v31  ;;  %v454_v30 = vmul.f32 %v442_v16, %v442_v16 }
 0x1f6   :  { %v1150_v35 = vpop.eup %1149  ;;  %519 = vadd.xlane.f32.xlu1 %v518_v33  ;;  %v566_v56 = vadd.f32 %v550_v43, %v549_v40  ;;  %v473_v33 = vsub.f32 %v1433_v53, %v442_v16 }
 0x1f7   :  { %v487_v39 = vmul.f32 %v1150_v35, %v463_v32  ;;  %v488_v42 = vmul.f32 %v1150_v35, %v464_v34  ;;  %v495_v59 = vmul.f32 %v1150_v35, %v471_v46  ;;  %v496_v60 = vmul.f32 %v1150_v35, %v472_v51 }
 0x1f8   :  { %564 = vadd.xlane.f32.xlu0 %v563_v36  ;;  %v578_v49 = vadd.f32 %v558_v58, %v557_v54  ;;  %v1571_v17 = vpop.permute.xlu1 %692  ;;  %v474_v32 = vsub.f32 %v1439_v57, %v442_v16  ;;  %v465_v34 = vsub.f32 %v1431_v52, %v442_v16  ;;  %v466_v35 = vsub.f32 %v1435_v55, %v442_v16  ;;  %v808_v55 = vld [vmem:[%s1770_s3 + $0x8] sm:$0xff]  ;;  %v770_v57 = vld [vmem:[%s1769_s2 + $0x18] sm:$0xff] }
 0x1f9   :  { %v1541_v48 = vmax.f32 %v487_v39, 0.0  ;;  %v1543_v50 = vmax.f32 %v488_v42, 0.0  ;;  %v1557_v62 = vmax.f32 %v495_v59, 0.0  ;;  %v1559_v63 = vmax.f32 %v496_v60, 0.0 }
 0x1fa   :  { %531 = vadd.xlane.f32.xlu1 %v530_v44 }
 0x1fb   :  { %v521_v41 = vadd.f32 %v1543_v50, %v1541_v48  ;;  %v551_v61 = vmul.f32 %v1541_v48, %v1541_v48  ;;  %v552_v45 = vmul.f32 %v1543_v50, %v1543_v50  ;;  %v533_v2 = vadd.f32 %v1559_v63, %v1557_v62 }
 0x1fc   :  { %576 = vadd.xlane.f32.xlu0 %v575_v47  ;;  %v559_v4 = vmul.f32 %v1557_v62, %v1557_v62  ;;  %v560_v7 = vmul.f32 %v1559_v63, %v1559_v63  ;;  %v1573_v15 = vpop.permute.xlu1 %773  ;;  %v1597_v47 = vpop.permute.xlu0 %677 }
 0x1fd   :  { %v569_v0 = vadd.f32 %v552_v45, %v551_v61 }
 0x1fe   :  { %567 = vadd.xlane.f32.xlu1 %v566_v56  ;;  %v581_v8 = vadd.f32 %v560_v7, %v559_v4 }
 0x200   :  { %522 = vadd.xlane.f32.xlu0 %v521_v41  ;;  %v1599_v51 = vpop.permute.xlu0 %778 }
 0x202   :  { %579 = vadd.xlane.f32.xlu1 %v578_v49 }
 0x204   :  { %570 = vadd.xlane.f32.xlu0 %v569_v0  ;;  %v1609_v61 = vpop.permute.xlu0 %813 }
 0x206   :  { %534 = vadd.xlane.f32.xlu1 %v533_v2 }
 0x20a   :  { %582 = vadd.xlane.f32.xlu1 %v581_v8 }
 0x228   :  { %v434_v22 = vpop.xlane.xlu1 %433 }
 0x229   :  { %v446_v23 = vadd.f32 %v434_v22, %v422_v20 }
 0x22b   :  { %v450_v27 = vmul.f32 0.001953125, %v446_v23 }
 0x22c   :  { %v1611_v49 = vpop.permute.xlu1 %783 }
 0x22d   :  { %v458_v24 = vsub.f32 %v450_v27, %v454_v30 }
 0x22f   :  { %v478_v29 = vadd.f32 1e-05, %v458_v24 }
 0x231   :  { %1151 = vrsqrt.f32 %v478_v29 }
 0x23b   :  { %v1152_v36 = vpop.eup %1151 }
 0x23c   :  { %v497_v37 = vmul.f32 %v1152_v36, %v473_v33  ;;  %v498_v38 = vmul.f32 %v1152_v36, %v474_v32  ;;  %v489_v39 = vmul.f32 %v1152_v36, %v465_v34  ;;  %v490_v42 = vmul.f32 %v1152_v36, %v466_v35 }
 0x23e   :  { %v1579_v44 = vmax.f32 %v497_v37, 0.0  ;;  %v1581_v40 = vmax.f32 %v498_v38, 0.0  ;;  %v1583_v43 = vmax.f32 %v489_v39, 0.0  ;;  %v1585_v46 = vmax.f32 %v490_v42, 0.0 }
 0x240   :  { %v536_v53 = vadd.f32 %v1581_v40, %v1579_v44  ;;  %v524_v52 = vadd.f32 %v1585_v46, %v1583_v43  ;;  %v561_v54 = vmul.f32 %v1579_v44, %v1579_v44  ;;  %v562_v56 = vmul.f32 %v1581_v40, %v1581_v40 }
 0x241   :  { %v553_v58 = vmul.f32 %v1583_v43, %v1583_v43  ;;  %v554_v59 = vmul.f32 %v1585_v46, %v1585_v46 }
 0x242   :  { %537 = vadd.xlane.f32.xlu1 %v536_v53  ;;  %525 = vadd.xlane.f32.xlu0 %v524_v52  ;;  %v584_v60 = vadd.f32 %v562_v56, %v561_v54 }
 0x243   :  { %v572_v41 = vadd.f32 %v554_v59, %v553_v58 }
 0x253   :  { %818 = vperm.xlu1 %1144, %v808_v55  }
 0x258   :  { %788 = vperm.xlu0 %1143, %v770_v57  }
 0x277   :  { %585 = vadd.xlane.f32.xlu1 %v584_v60  ;;  %573 = vadd.xlane.f32.xlu0 %v572_v41 }
 0x27d   :  { %v517_v45 = vpop.xlane.xlu0 %516 }
 0x27e   :  { %v539_v2 = vmul.f32 0.00390625, %v517_v45 }
 0x280   :  { %v611_v9 = vmul.f32 %v539_v2, %v539_v2  ;;  %v663_v14 = vmul.f32 %v1471_v6, %v539_v2 }
 0x281   :  { %v529_v0 = vpop.xlane.xlu0 %528 }
 0x282   :  { %v1613_v8 = vmul.f32 0.00390625, %v529_v0 }
 0x283   :  { %v520_v4 = vpop.xlane.xlu1 %519 }
 0x284   :  { %v1616_v16 = vmul.f32 0.00390625, %v520_v4  ;;  %v615_v30 = vmul.f32 %v1613_v8, %v1613_v8  ;;  %v667_v29 = vmul.f32 %v1471_v6, %v1613_v8 }
 0x285   :  { %v565_v7 = vpop.xlane.xlu0 %564 }
 0x286   :  { %v587_v19 = vmul.f32 0.00390625, %v565_v7  ;;  %v612_v33 = vmul.f32 %v1616_v16, %v1616_v16  ;;  %v664_v53 = vmul.f32 %v1454_v1, %v1616_v16  ;;  %v595_v7 = vsub.f32 %v1495_v11, %v539_v2 }
 0x287   :  { %v532_v20 = vpop.xlane.xlu1 %531 }
 0x288   :  { %v619_v22 = vsub.f32 %v587_v19, %v611_v9  ;;  %713 = vperm.xlu1 %1144, %v663_v14   ;;  %v544_v34 = vmul.f32 0.00390625, %v532_v20  ;;  %v596_v9 = vsub.f32 %v1497_v12, %v539_v2  ;;  %v604_v2 = vsub.f32 %v1505_v21, %v1613_v8 }
 0x289   :  { %v577_v23 = vpop.xlane.xlu0 %576 }
 0x28a   :  { %v627_v27 = vadd.f32 1e-05, %v619_v22  ;;  %v591_v24 = vmul.f32 0.00390625, %v577_v23  ;;  %v616_v6 = vmul.f32 %v544_v34, %v544_v34  ;;  %v668_v56 = vmul.f32 %v1454_v1, %v544_v34 }
 0x28b   :  { %v568_v32 = vpop.xlane.xlu1 %567 }
 0x28c   :  { %1153 = vrsqrt.f32 %v627_v27  ;;  %v623_v35 = vsub.f32 %v591_v24, %v615_v30  ;;  %v588_v36 = vmul.f32 0.00390625, %v568_v32  ;;  %733 = vperm.xlu1 %1144, %v667_v29   ;;  %v603_v29 = vsub.f32 %v1503_v18, %v1613_v8 }
 0x28d   :  { %v523_v37 = vpop.xlane.xlu0 %522 }
 0x28e   :  { %v631_v38 = vadd.f32 1e-05, %v623_v35  ;;  %v620_v39 = vsub.f32 %v588_v36, %v612_v33  ;;  %v541_v42 = vmul.f32 0.00390625, %v523_v37  ;;  %v598_v37 = vsub.f32 %v1515_v26, %v1616_v16 }
 0x28f   :  { %v580_v52 = vpop.xlane.xlu1 %579 }
 0x290   :  { %1155 = vrsqrt.f32 %v631_v38  ;;  %v628_v55 = vadd.f32 1e-05, %v620_v39  ;;  %v592_v57 = vmul.f32 0.00390625, %v580_v52  ;;  %718 = vperm.xlu1 %1144, %v664_v53   ;;  %v613_v59 = vmul.f32 %v541_v42, %v541_v42 }
 0x291   :  { %v571_v54 = vpop.xlane.xlu0 %570  ;;  %v665_v20 = vmul.f32 %v1460_v3, %v541_v42 }
 0x292   :  { %1157 = vrsqrt.f32 %v628_v55  ;;  %v624_v58 = vsub.f32 %v592_v57, %v616_v6  ;;  %v589_v60 = vmul.f32 0.00390625, %v571_v54  ;;  %v605_v55 = vsub.f32 %v1521_v28, %v544_v34 }
 0x293   :  { %v535_v41 = vpop.xlane.xlu1 %534  ;;  %v606_v6 = vsub.f32 %v1523_v31, %v544_v34 }
 0x294   :  { %v632_v45 = vadd.f32 1e-05, %v624_v58  ;;  %v621_v0 = vsub.f32 %v589_v60, %v613_v59  ;;  %v545_v4 = vmul.f32 0.00390625, %v535_v41  ;;  %738 = vperm.xlu1 %1144, %v668_v56   ;;  %v599_v56 = vsub.f32 %v1541_v48, %v541_v42 }
 0x295   :  { %v600_v58 = vsub.f32 %v1543_v50, %v541_v42 }
 0x296   :  { %v1154_v19 = vpop.eup %1153  ;;  %1159 = vrsqrt.f32 %v632_v45  ;;  %v629_v14 = vadd.f32 1e-05, %v621_v0  ;;  %v669_v1 = vmul.f32 %v1460_v3, %v545_v4  ;;  %v617_v30 = vmul.f32 %v545_v4, %v545_v4 }
 0x297   :  { %v583_v22 = vpop.xlane.xlu1 %582  ;;  %v643_v23 = vmul.f32 %v1154_v19, %v595_v7  ;;  %v644_v27 = vmul.f32 %v1154_v19, %v596_v9  ;;  %v597_v3 = vsub.f32 %v1513_v25, %v1616_v16  ;;  %v607_v41 = vsub.f32 %v1557_v62, %v545_v4 }
 0x298   :  { %1161 = vrsqrt.f32 %v629_v14  ;;  %v593_v24 = vmul.f32 0.00390625, %v583_v22  ;;  %723 = vperm.xlu1 %1144, %v665_v20   ;;  %743 = vperm.xlu0 %1143, %v669_v1   ;;  %v608_v45 = vsub.f32 %v1559_v63, %v545_v4  ;;  %v810_v4 = vld [vmem:[%s1770_s3 + $0x18] sm:$0xff]  ;;  %v809_v22 = vld [vmem:[%s1770_s3 + $0x10] sm:$0xff]  ;;  %s1310_s3 = smov [#allocation7]  }
 0x299   :  { %s980_s16 = sshll.u32 %s1310_s3, 4  ;;  %s981_s16 = int_to_ptr.vmem [resolvable:$true] %s980_s16 }
 0x29a   :  { %v1156_v33 = vpop.eup %1155  ;;  %v625_v32 = vsub.f32 %v593_v24, %v617_v30  ;;  %s1277_s0 = scalar_lea.vmem %s981_s16, 512  ;;  %p1282_p3 = scmp.lt.s32.totalorder %s981_s16, %s981_s16 }
 0x29b   :  { %v651_v35 = vmul.f32 %v1156_v33, %v603_v29  ;;  %v652_v36 = vmul.f32 %v1156_v33, %v604_v2  ;;  %v695_v29 = vmul.f32 %v1597_v47, %v643_v23  ;;  %v696_v2 = vmul.f32 %v1597_v47, %v644_v27  ;;  %p1278_p2 = scmp.ne.s32.totalorder %s981_s16, %s1277_s0  ;;  %p1283_p4 = scmp.lt.s32.totalorder %s1277_s0, %s1277_s0 }
 0x29c   :  { %v1158_v38 = vpop.eup %1157  ;;  %v633_v39 = vadd.f32 1e-05, %v625_v32 }
 0x29d   :  { %v645_v53 = vmul.f32 %v1158_v38, %v597_v3  ;;  %v646_v52 = vmul.f32 %v1158_v38, %v598_v37  ;;  %v703_v38 = vmul.f32 %v1597_v47, %v651_v35  ;;  %p1284_p5 = por %p1283_p4, %p1282_p3 }
 0x29e   :  { %1163 = vrsqrt.f32 %v633_v39  ;;  %v704_v39 = vmul.f32 %v1597_v47, %v652_v36 }
 0x29f   :  { %p1285_p6 = pnand %p1284_p5, %p1278_p2 }
 0x2a0   :  { %v1160_v8 = vpop.eup %1159 }
 0x2a1   :  { %v653_v57 = vmul.f32 %v1160_v8, %v605_v55  ;;  %v654_v54 = vmul.f32 %v1160_v8, %v606_v6 }
 0x2a2   :  { %v1162_v59 = vpop.eup %1161 }
 0x2a3   :  { %v1643_v60 = vmul.f32 %v1162_v59, %v599_v56  ;;  %v1645_v16 = vmul.f32 %v1162_v59, %v600_v58 }
 0x2a8   :  { %v1164_v0 = vpop.eup %1163 }
 0x2a9   :  { %v1649_v7 = vmul.f32 %v1164_v0, %v607_v41  ;;  %v1651_v34 = vmul.f32 %v1164_v0, %v608_v45  ;;  %v697_v41 = vmul.f32 %v1567_v10, %v645_v53  ;;  %v698_v0 = vmul.f32 %v1567_v10, %v646_v52 }
 0x2cf   :  { %v538_v9 = vpop.xlane.xlu1 %537  ;;  %v526_v19 = vpop.xlane.xlu0 %525 }
 0x2d0   :  { %v1653_v14 = vmul.f32 0.00390625, %v538_v9  ;;  %v1655_v20 = vmul.f32 0.00390625, %v526_v19 }
 0x2d2   :  { %v670_v42 = vmul.f32 %v1466_v5, %v1653_v14  ;;  %v666_v1 = vmul.f32 %v1466_v5, %v1655_v20 }
 0x2d3   :  { %v819_v30 = vpop.permute.xlu1 %818 }
 0x2d4   :  { %748 = vperm.xlu0 %1143, %v670_v42   ;;  %728 = vperm.xlu1 %1144, %v666_v1   ;;  %v705_v42 = vmul.f32 %v1567_v10, %v653_v57 }
 0x2d8   :  { %828 = vperm.xlu0 %1143, %v810_v4   ;;  %823 = vperm.xlu1 %1144, %v809_v22  }
 0x304   :  { %v1667_v24 = vpop.xlane.xlu1 %585 }
 0x308   :  { %v714_v5 = vpop.permute.xlu1 %713 }
 0x309   :  { %v751_v33 = vadd.f32 %v714_v5, %v695_v29  ;;  %v752_v32 = vadd.f32 %v714_v5, %v696_v2 }
 0x30b   :  { %v791_v3 = vmul.f32 %v1573_v15, %v751_v33  ;;  %v792_v37 = vmul.f32 %v1573_v15, %v752_v32 }
 0x30c   :  { %v734_v55 = vpop.permute.xlu1 %733 }
 0x30d   :  { %v831_v6 = vadd.f32 %v1609_v61, %v791_v3  ;;  %v832_v8 = vadd.f32 %v1609_v61, %v792_v37  ;;  %v759_v56 = vadd.f32 %v734_v55, %v703_v38  ;;  %v760_v23 = vadd.f32 %v734_v55, %v704_v39 }
 0x30f   :  { %v993_v58 = vmul.f32 -1.442695, %v831_v6  ;;  %v799_v27 = vmul.f32 %v1573_v15, %v759_v56  ;;  %v800_v59 = vmul.f32 %v1573_v15, %v760_v23  ;;  %v994_v45 = vmul.f32 -1.442695, %v832_v8 }
 0x310   :  { %v719_v35 = vpop.permute.xlu1 %718  ;;  %v706_v15 = vmul.f32 %v1567_v10, %v654_v54 }
 0x311   :  { %v839_v47 = vadd.f32 %v1609_v61, %v799_v27  ;;  %v840_v36 = vadd.f32 %v1609_v61, %v800_v59  ;;  %v753_v9 = vadd.f32 %v719_v35, %v697_v41  ;;  %v754_v19 = vadd.f32 %v719_v35, %v698_v0 }
 0x312   :  { %1165 = vpow2.f32 %v993_v58 }
 0x313   :  { %v1001_v1 = vmul.f32 -1.442695, %v839_v47  ;;  %v793_v4 = vmul.f32 %v1599_v51, %v753_v9  ;;  %1167 = vpow2.f32 %v994_v45  ;;  %v1002_v53 = vmul.f32 -1.442695, %v840_v36  ;;  %v1689_v9 = vpop.permute.xlu0 %788 }
 0x314   :  { %v794_v22 = vmul.f32 %v1599_v51, %v754_v19  ;;  %v739_v52 = vpop.permute.xlu1 %738 }
 0x315   :  { %v833_v29 = vadd.f32 %v819_v30, %v793_v4  ;;  %v761_v2 = vadd.f32 %v739_v52, %v705_v42  ;;  %v762_v5 = vadd.f32 %v739_v52, %v706_v15  ;;  %1169 = vpow2.f32 %v1001_v1 }
 0x316   :  { %v834_v33 = vadd.f32 %v819_v30, %v794_v22  ;;  %1171 = vpow2.f32 %v1002_v53 }
 0x317   :  { %v995_v61 = vmul.f32 -1.442695, %v833_v29  ;;  %v801_v32 = vmul.f32 %v1599_v51, %v761_v2  ;;  %v802_v57 = vmul.f32 %v1599_v51, %v762_v5  ;;  %v574_v22 = vpop.xlane.xlu0 %573 }
 0x318   :  { %v996_v3 = vmul.f32 -1.442695, %v834_v33  ;;  %v594_v33 = vmul.f32 0.00390625, %v1667_v24 }
 0x319   :  { %1173 = vpow2.f32 %v995_v61  ;;  %v841_v37 = vadd.f32 %v819_v30, %v801_v32  ;;  %v842_v10 = vadd.f32 %v819_v30, %v802_v57  ;;  %v590_v57 = vmul.f32 0.00390625, %v574_v22 }
 0x31a   :  { %1175 = vpow2.f32 %v996_v3 }
 0x31b   :  { %v1003_v54 = vmul.f32 -1.442695, %v841_v37  ;;  %v1004_v38 = vmul.f32 -1.442695, %v842_v10 }
 0x31c   :  { %v1166_v39 = vpop.eup %1165 }
 0x31d   :  { %1177 = vpow2.f32 %v1003_v54  ;;  %v1168_v55 = vpop.eup %1167  ;;  %v895_v6 = vadd.f32 1.0, %v1166_v39 }
 0x31e   :  { %1179 = vpow2.f32 %v1004_v38  ;;  %v896_v56 = vadd.f32 1.0, %v1168_v55 }
 0x31f   :  { %v1170_v8 = vpop.eup %1169  ;;  %1181 = vrcp.f32 %v895_v6 }
 0x320   :  { %v1172_v23 = vpop.eup %1171  ;;  %v903_v51 = vadd.f32 1.0, %v1170_v8  ;;  %1183 = vrcp.f32 %v896_v56  ;;  %v601_v8 = vsub.f32 %v1583_v43, %v1655_v20  ;;  %v602_v56 = vsub.f32 %v1585_v46, %v1655_v20 }
 0x321   :  { %v904_v45 = vadd.f32 1.0, %v1172_v23  ;;  %v724_v23 = vpop.permute.xlu1 %723 }
 0x323   :  { %v1174_v58 = vpop.eup %1173 }
 0x324   :  { %v1176_v27 = vpop.eup %1175  ;;  %v897_v59 = vadd.f32 1.0, %v1174_v58  ;;  %v744_v58 = vpop.permute.xlu0 %743 }
 0x325   :  { %v898_v41 = vadd.f32 1.0, %v1176_v27 }
 0x326   :  { %1185 = vrcp.f32 %v897_v59 }
 0x327   :  { %v1178_v30 = vpop.eup %1177  ;;  %1187 = vrcp.f32 %v898_v41 }
 0x328   :  { %1189 = vrcp.f32 %v903_v51  ;;  %v905_v0 = vadd.f32 1.0, %v1178_v30  ;;  %v1180_v35 = vpop.eup %1179  ;;  %v699_v30 = vmul.f32 %v1569_v13, %v1643_v60 }
 0x329   :  { %v906_v47 = vadd.f32 1.0, %v1180_v35  ;;  %v1182_v36 = vpop.eup %1181 }
 0x32a   :  { %1191 = vrcp.f32 %v905_v0  ;;  %v1184_v19 = vpop.eup %1183  ;;  %v943_v4 = vmul.f32 %v1182_v36, %v1495_v11  ;;  %v708_v0 = vmul.f32 %v1569_v13, %v1651_v34  ;;  %v755_v35 = vadd.f32 %v724_v23, %v699_v30 }
 0x32b   :  { %1193 = vrcp.f32 %v904_v45  ;;  %v944_v52 = vmul.f32 %v1184_v19, %v1497_v12  ;;  %v614_v12 = vmul.f32 %v1655_v20, %v1655_v20  ;;  %v700_v45 = vmul.f32 %v1569_v13, %v1645_v16 }
 0x32c   :  { %1195 = vrcp.f32 %v906_v47  ;;  %v707_v20 = vmul.f32 %v1569_v13, %v1649_v7  ;;  %v764_v36 = vadd.f32 %v744_v58, %v708_v0  ;;  %v795_v13 = vmul.f32 %v1611_v49, %v755_v35 }
 0x32d   :  { %v622_v38 = vsub.f32 %v590_v57, %v614_v12 }
 0x32e   :  { %v763_v47 = vadd.f32 %v744_v58, %v707_v20 }
 0x32f   :  { %v630_v55 = vadd.f32 1e-05, %v622_v38 }
 0x330   :  { %v1186_v42 = vpop.eup %1185  ;;  %v803_v34 = vmul.f32 %v1611_v49, %v763_v47 }
 0x331   :  { %v1188_v1 = vpop.eup %1187  ;;  %v945_v15 = vmul.f32 %v1186_v42, %v1513_v25  ;;  %v618_v25 = vmul.f32 %v1653_v14, %v1653_v14 }
 0x332   :  { %v1190_v53 = vpop.eup %1189  ;;  %v946_v29 = vmul.f32 %v1188_v1, %v1515_v26 }
 0x333   :  { %v1695_v2 = vadd.f32 %v945_v15, %v943_v4  ;;  %v951_v3 = vmul.f32 %v1190_v53, %v1503_v18  ;;  %v626_v10 = vsub.f32 %v594_v33, %v618_v25 }
 0x334   :  { %v1192_v5 = vpop.eup %1191  ;;  %v1698_v61 = vadd.f32 %v946_v29, %v944_v52  ;;  %v804_v52 = vmul.f32 %v1611_v49, %v764_v36 }
 0x335   :  { %v1194_v32 = vpop.eup %1193  ;;  %v953_v11 = vmul.f32 %v1192_v5, %v1521_v28  ;;  %v634_v18 = vadd.f32 1e-05, %v626_v10 }
 0x336   :  { %v1196_v37 = vpop.eup %1195  ;;  %v952_v24 = vmul.f32 %v1194_v32, %v1505_v21  ;;  %v609_v21 = vsub.f32 %v1579_v44, %v1653_v14 }
 0x337   :  { %v1706_v26 = vadd.f32 %v953_v11, %v951_v3  ;;  %v954_v54 = vmul.f32 %v1196_v37, %v1523_v31  ;;  %1197 = vrsqrt.f32 %v634_v18  ;;  %v610_v31 = vsub.f32 %v1581_v40, %v1653_v14 }
 0x338   :  { %1199 = vrsqrt.f32 %v630_v55  ;;  %v756_v14 = vadd.f32 %v724_v23, %v700_v45 }
 0x339   :  { %v1710_v39 = vadd.f32 %v954_v54, %v952_v24 }
 0x33a   :  { %v796_v29 = vmul.f32 %v1611_v49, %v756_v14 }
 0x341   :  { %v1198_v28 = vpop.eup %1197 }
 0x342   :  { %v1200_v6 = vpop.eup %1199  ;;  %v657_v59 = vmul.f32 %v1198_v28, %v609_v21  ;;  %v658_v41 = vmul.f32 %v1198_v28, %v610_v31 }
 0x343   :  { %v649_v27 = vmul.f32 %v1200_v6, %v601_v8  ;;  %v650_v51 = vmul.f32 %v1200_v6, %v602_v56 }
 0x344   :  { %v709_v1 = vmul.f32 %v1571_v17, %v657_v59  ;;  %v710_v60 = vmul.f32 %v1571_v17, %v658_v41 }
 0x345   :  { %v701_v19 = vmul.f32 %v1571_v17, %v649_v27  ;;  %v702_v42 = vmul.f32 %v1571_v17, %v650_v51 }
 0x353   :  { %v729_v4 = vpop.permute.xlu1 %728  ;;  %v749_v16 = vpop.permute.xlu0 %748 }
 0x354   :  { %v757_v15 = vadd.f32 %v729_v4, %v701_v19  ;;  %v758_v53 = vadd.f32 %v729_v4, %v702_v42  ;;  %v765_v7 = vadd.f32 %v749_v16, %v709_v1  ;;  %v766_v22 = vadd.f32 %v749_v16, %v710_v60 }
 0x356   :  { %v797_v5 = vmul.f32 %v1689_v9, %v757_v15  ;;  %v798_v33 = vmul.f32 %v1689_v9, %v758_v53  ;;  %v805_v17 = vmul.f32 %v1689_v9, %v765_v7  ;;  %v806_v32 = vmul.f32 %v1689_v9, %v766_v22 }
 0x357   :  { %v824_v57 = vpop.permute.xlu1 %823  ;;  %v829_v3 = vpop.permute.xlu0 %828 }
 0x358   :  { %v835_v11 = vadd.f32 %v824_v57, %v795_v13  ;;  %v836_v25 = vadd.f32 %v824_v57, %v796_v29  ;;  %v843_v37 = vadd.f32 %v824_v57, %v803_v34  ;;  %v844_v12 = vadd.f32 %v824_v57, %v804_v52 }
 0x359   :  { %v837_v10 = vadd.f32 %v829_v3, %v797_v5  ;;  %v838_v24 = vadd.f32 %v829_v3, %v798_v33  ;;  %v845_v49 = vadd.f32 %v829_v3, %v805_v17  ;;  %v846_v28 = vadd.f32 %v829_v3, %v806_v32 }
 0x35a   :  { %v997_v54 = vmul.f32 -1.442695, %v835_v11  ;;  %v998_v38 = vmul.f32 -1.442695, %v836_v25  ;;  %v1005_v18 = vmul.f32 -1.442695, %v843_v37 }
 0x35b   :  { %v1006_v55 = vmul.f32 -1.442695, %v844_v12  ;;  %v999_v6 = vmul.f32 -1.442695, %v837_v10  ;;  %v1000_v8 = vmul.f32 -1.442695, %v838_v24 }
 0x35c   :  { %1201 = vpow2.f32 %v997_v54  ;;  %v1007_v9 = vmul.f32 -1.442695, %v845_v49  ;;  %v1008_v56 = vmul.f32 -1.442695, %v846_v28 }
 0x35d   :  { %1203 = vpow2.f32 %v998_v38 }
 0x35e   :  { %1205 = vpow2.f32 %v1005_v18 }
 0x35f   :  { %1207 = vpow2.f32 %v1006_v55 }
 0x360   :  { %1209 = vpow2.f32 %v999_v6 }
 0x361   :  { %1211 = vpow2.f32 %v1000_v8 }
 0x362   :  { %1213 = vpow2.f32 %v1007_v9 }
 0x363   :  { %1215 = vpow2.f32 %v1008_v56 }
 0x366   :  { %v1202_v21 = vpop.eup %1201 }
 0x367   :  { %v1204_v31 = vpop.eup %1203  ;;  %v899_v23 = vadd.f32 1.0, %v1202_v21 }
 0x368   :  { %v1206_v58 = vpop.eup %1205  ;;  %v900_v27 = vadd.f32 1.0, %v1204_v31 }
 0x369   :  { %v1208_v51 = vpop.eup %1207  ;;  %v907_v59 = vadd.f32 1.0, %v1206_v58  ;;  %1217 = vrcp.f32 %v899_v23 }
 0x36a   :  { %v1210_v41 = vpop.eup %1209  ;;  %v908_v30 = vadd.f32 1.0, %v1208_v51  ;;  %1219 = vrcp.f32 %v900_v27 }
 0x36b   :  { %v1212_v45 = vpop.eup %1211  ;;  %1221 = vrcp.f32 %v907_v59  ;;  %v901_v20 = vadd.f32 1.0, %v1210_v41 }
 0x36c   :  { %v1214_v0 = vpop.eup %1213  ;;  %1223 = vrcp.f32 %v908_v30  ;;  %v902_v35 = vadd.f32 1.0, %v1212_v45 }
 0x36d   :  { %v1216_v14 = vpop.eup %1215  ;;  %v909_v47 = vadd.f32 1.0, %v1214_v0  ;;  %1225 = vrcp.f32 %v901_v20 }
 0x36e   :  { %v910_v36 = vadd.f32 1.0, %v1216_v14  ;;  %1227 = vrcp.f32 %v902_v35 }
 0x36f   :  { %1229 = vrcp.f32 %v909_v47 }
 0x370   :  { %1231 = vrcp.f32 %v910_v36 }
 0x373   :  { %v1218_v19 = vpop.eup %1217 }
 0x374   :  { %v1220_v42 = vpop.eup %1219  ;;  %v947_v1 = vmul.f32 %v1218_v19, %v1541_v48 }
 0x375   :  { %v1222_v60 = vpop.eup %1221  ;;  %v948_v4 = vmul.f32 %v1220_v42, %v1543_v50 }
 0x376   :  { %v1224_v16 = vpop.eup %1223  ;;  %v955_v15 = vmul.f32 %v1222_v60, %v1557_v62  ;;  %v963_v53 = vadd.f32 %v1695_v2, %v947_v1 }
 0x377   :  { %v1226_v7 = vpop.eup %1225  ;;  %v956_v22 = vmul.f32 %v1224_v16, %v1559_v63  ;;  %v964_v13 = vadd.f32 %v1698_v61, %v948_v4 }
 0x378   :  { %v1228_v34 = vpop.eup %1227  ;;  %v949_v52 = vmul.f32 %v1226_v7, %v1583_v43  ;;  %v965_v29 = vadd.f32 %v1706_v26, %v955_v15 }
 0x379   :  { %v1230_v5 = vpop.eup %1229  ;;  %v950_v48 = vmul.f32 %v1228_v34, %v1585_v46  ;;  %v966_v50 = vadd.f32 %v1710_v39, %v956_v22 }
 0x37a   :  { %v1232_v33 = vpop.eup %1231  ;;  %v957_v62 = vmul.f32 %v1230_v5, %v1579_v44  ;;  %v967_v17 = vadd.f32 %v963_v53, %v949_v52 }
 0x37b   :  { %v958_v63 = vmul.f32 %v1232_v33, %v1581_v40  ;;  %v968_v2 = vadd.f32 %v964_v13, %v950_v48 }
 0x37c   :  { %v969_v61 = vadd.f32 %v965_v29, %v957_v62  ;;  %971 = vst [vmem:[#allocation7] sm:$0xff] %v967_v17 }
 0x37d   :  { %v970_v32 = vadd.f32 %v966_v50, %v958_v63  ;;  %972 = vst [vmem:[#allocation7 + $0x8] sm:$0xff] %v968_v2 }
 0x37e   :  { %973 = vst [vmem:[#allocation7 + $0x10] sm:$0xff] %v969_v61 }
 0x37f   :  { %974 = vst [vmem:[#allocation7 + $0x18] sm:$0xff] %v970_v32 }
 0x380   :  { %1288 = shalt.err (!%p1285_p6)
}
 0x381   :  { %s1289_s18 = scalar_lea.hbm %s1772_s5, 512 }
 0x382   :  { %p1290_p7 = scmp.ne.s32.totalorder %s1772_s5, %s1289_s18  ;;  %p1293_p8 = scmp.lt.u32.totalorder %s1289_s18, %s1772_s5 }
 0x384   :  { %p1295_p9 = pnand %p1293_p8, %p1290_p7 }
 0x386   :  { %1298 = shalt.err (!%p1295_p9)
}
 0x387   :  { %986 = dma.vmem_to_hbm [thread:$0]  %s981_s16, 512, %s1772_s5, [#allocation4], %s1306_s28, %s1306_s28, %s1307_s29  }
 0x388   :  { %1303 = dma.done.wait [#allocation4], 512  }
 0x389   :  { %1304 = vsyncadd [#allocation4], 4294966784 }
 0x38a   :  { %990 = vsyncpa [#allocation3], 1 }
 0x38b   :  { %991 = vsyncpa [#allocation6], 1 }
 0x38c   :  { %992 = vsyncpa [#allocation4], 1 }

</bundles_post_ra>
